<compile_context>
chip_gen: v7x
topology: tpu7x:2x2x1
jax: 0.10.0
libtpu: 0.0.40
codegen_flags: <defaults>
</compile_context>

<pallas_src>
import functools
import math

import jax
import jax.numpy as jnp
from jax import lax
from jax.experimental import pallas as pl
from jax.experimental.pallas import tpu as pltpu

LANE = 128


def _round_up(x, m):
    return (x + m - 1) // m * m


# ------------------------- packed slab layouts -------------------------
# square weight slab (9, D, D), bf16:
_W_LW1, _W_LW2, _W_LW3 = 0, 1, 2          # latent head
_W_WO = 3                                 # attention output proj
_W_WF1, _W_WF2 = 4, 5                     # encoder FFN
_W_PW1, _W_PW2, _W_PW3 = 6, 7, 8          # output projection
_NUM_W = 9

# bias / LN slab (14, 3*D), f32:
_B_LB1, _B_LB2, _B_LB3 = 0, 1, 2
_B_QKV, _B_BO = 3, 4
_B_G1, _B_BE1 = 5, 6
_B_BF1, _B_BF2 = 7, 8
_B_G2, _B_BE2 = 9, 10
_B_PB1, _B_PB2, _B_PB3 = 11, 12, 13
_NUM_BIAS_ROWS = 14


# ----------------------------- in-kernel helpers -----------------------------

def _gelu_tanh(x):
    # tanh-form GELU (jnp.tanh lowers to the EUP slot); |err| vs exact erf GELU ~3e-4.
    c = 0.7978845608028654  # sqrt(2/pi)
    return 0.5 * x * (1.0 + jnp.tanh(c * (x + 0.044715 * x * x * x)))


# --------------------------------- kernel ------------------------------------

def _decoder_kernel(x_ref, w_ref, wqkv_ref, b_ref, out_ref, *, batch, e_real, eps):
    n_tok, d = x_ref.shape              # N = S*B tokens, D = padded embed == padded ff

    def bias(row, width):
        # (1, width) bias / LN-param row from the packed slab (static slice).
        return b_ref[row:row + 1, :width]

    def mm(a, w):
        # bf16 x bf16 MXU matmul, f32 accumulation.
        return jnp.dot(a.astype(jnp.bfloat16), w, preferred_element_type=jnp.float32)

    # mask of "real" embedding columns; padded columns stay exactly zero so residual
    # adds and LayerNorm statistics only see the true E features.
    col = lax.broadcasted_iota(jnp.int32, (1, d), 1)
    col_mask = col < e_real
    inv_e = 1.0 / e_real

    def layer_norm(x, g_row, b_row):
        mu = jnp.sum(x, axis=-1, keepdims=True) * inv_e        # pad cols are zero
        xc = jnp.where(col_mask, x - mu, 0.0)
        var = jnp.sum(xc * xc, axis=-1, keepdims=True) * inv_e
        return xc * lax.rsqrt(var + eps) * bias(g_row, d) + bias(b_row, d)

    x = x_ref[...]                                             # (N, D) f32

    # ---- latent_head: Linear -> ReLU -> Linear -> ReLU -> Linear (dropout=id) ----
    z = jnp.maximum(mm(x, w_ref[_W_LW1]) + bias(_B_LB1, d), 0.0)
    z = jnp.maximum(mm(z, w_ref[_W_LW2]) + bias(_B_LB2, d), 0.0)
    z = mm(z, w_ref[_W_LW3]) + bias(_B_LB3, d)

    # ---- TransformerEncoderLayer (post-LN, nhead=1, activation=gelu) ----
    # Fused QKV projection; 1/sqrt(head_dim) already folded into the q columns/bias.
    qkv = mm(z, wqkv_ref[...]) + bias(_B_QKV, 3 * d)           # (N, 3D)
    q = qkv[:, :d]
    k = qkv[:, d:2 * d]
    v = qkv[:, 2 * d:3 * d]

    sc = lax.dot_general(q.astype(jnp.bfloat16), k.astype(jnp.bfloat16),
                         (((1,), (1,)), ((), ())),
                         preferred_element_type=jnp.float32)   # (N, N)
    # tokens are seq-major (token = s*B + b) -> same batch iff index % B matches.
    row_b = lax.broadcasted_iota(jnp.int32, (n_tok, n_tok), 0) % batch
    col_b = lax.broadcasted_iota(jnp.int32, (n_tok, n_tok), 1) % batch
    sc = jnp.where(row_b == col_b, sc, -1e30)                  # block batch mask
    sc = sc - jnp.max(sc, axis=-1, keepdims=True)
    p_exp = jnp.exp(sc)
    att = p_exp * pl.reciprocal(jnp.sum(p_exp, axis=-1, keepdims=True), approx=True)
    ctx = jnp.dot(att.astype(jnp.bfloat16), v.astype(jnp.bfloat16),
                  preferred_element_type=jnp.float32)          # (N, D), stays in vregs
    attn_out = mm(ctx, w_ref[_W_WO]) + bias(_B_BO, d)

    h = layer_norm(z + attn_out, _B_G1, _B_BE1)

    ff = mm(h, w_ref[_W_WF1]) + bias(_B_BF1, d)
    ff = _gelu_tanh(ff)
    ff = mm(ff, w_ref[_W_WF2]) + bias(_B_BF2, d)
    h = layer_norm(h + ff, _B_G2, _B_BE2)

    # ---- output_projection: Linear -> ReLU -> Linear -> ReLU -> Linear (dropout=id) ----
    y = jnp.maximum(mm(h, w_ref[_W_PW1]) + bias(_B_PB1, d), 0.0)
    y = jnp.maximum(mm(y, w_ref[_W_PW2]) + bias(_B_PB2, d), 0.0)
    # lane-dense (N, D) output slab; wrapper slices [:, :output_dim]
    out_ref[...] = mm(y, w_ref[_W_PW3]) + bias(_B_PB3, d)


# ------------------------------ param packing ---------------------------------

def pack_params(params, embed_dim, dim_feedforward, output_dim):
    """Pad to lane-dense widths, cast weights to bf16, pack into 3 operands."""
    E, FF, OUT = embed_dim, dim_feedforward, output_dim
    EP = _round_up(max(E, OUT), LANE)
    FP = _round_up(FF, LANE)
    assert EP == FP, "single square weight slab requires padded(E) == padded(FF)"
    D = EP
    BW = 3 * D
    scale = 1.0 / math.sqrt(E)          # head_dim = E / nhead, nhead = 1

    def pad_mat(w, rows, cols):
        out = jnp.zeros((rows, cols), jnp.float32)
        return out.at[:w.shape[0], :w.shape[1]].set(w.astype(jnp.float32))

    def pad_vec(v, cols):
        v = jnp.asarray(v, jnp.float32).reshape(-1)
        out = jnp.zeros((cols,), jnp.float32)
        return out.at[:v.shape[0]].set(v)

    p = params
    w_all = jnp.stack([
        pad_mat(p["lw1"], D, D), pad_mat(p["lw2"], D, D), pad_mat(p["lw3"], D, D),
        pad_mat(p["wo"], D, D),
        pad_mat(p["wf1"], D, D), pad_mat(p["wf2"], D, D),
        pad_mat(p["pw1"], D, D), pad_mat(p["pw2"], D, D), pad_mat(p["pw3"], D, D),
    ]).astype(jnp.bfloat16)                                    # (9, D, D) bf16

    w_qkv = jnp.concatenate([pad_mat(p["wq"] * scale, D, D),   # scale folded into q
                             pad_mat(p["wk"], D, D),
                             pad_mat(p["wv"], D, D)], axis=1).astype(jnp.bfloat16)  # (D, 3D)

    rows = [None] * _NUM_BIAS_ROWS
    rows[_B_LB1] = pad_vec(p["lb1"], BW)
    rows[_B_LB2] = pad_vec(p["lb2"], BW)
    rows[_B_LB3] = pad_vec(p["lb3"], BW)
    rows[_B_QKV] = jnp.concatenate([pad_vec(p["bq"] * scale, D),
                                    pad_vec(p["bk"], D),
                                    pad_vec(p["bv"], D)])
    rows[_B_BO] = pad_vec(p["bo"], BW)
    rows[_B_G1] = pad_vec(p["g1"], BW)
    rows[_B_BE1] = pad_vec(p["be1"], BW)
    rows[_B_BF1] = pad_vec(p["bf1"], BW)
    rows[_B_BF2] = pad_vec(p["bf2"], BW)
    rows[_B_G2] = pad_vec(p["g2"], BW)
    rows[_B_BE2] = pad_vec(p["be2"], BW)
    rows[_B_PB1] = pad_vec(p["pb1"], BW)
    rows[_B_PB2] = pad_vec(p["pb2"], BW)
    rows[_B_PB3] = pad_vec(p["pb3"], BW)
    biases = jnp.stack(rows)                                   # (14, 3D) f32

    meta = dict(embed_dim=E, dim_feedforward=FF, output_dim=OUT, d=D)
    return dict(w_all=w_all, w_qkv=w_qkv, biases=biases, meta=meta)


# -------------------------------- wrapper -------------------------------------

def transformer_decoder_forward(x_sbe, packed):
    """x_sbe: (S, B, E) float32 (PyTorch batch_first=False). Returns (S, B, output_dim)."""
    meta = packed["meta"]
    E, OUT, D = meta["embed_dim"], meta["output_dim"], meta["d"]
    S, B, E_in = x_sbe.shape
    assert E_in == E, (E_in, E)
    N = S * B

    # seq-major token rows (token = s*B + b): no transpose, just pad to lane width.
    x2d = jnp.pad(x_sbe.reshape(N, E).astype(jnp.float32), ((0, 0), (0, D - E)))

    operands = (x2d, packed["w_all"], packed["w_qkv"], packed["biases"])

    # Advisory cost estimate for XLA scheduling around the custom call.
    flops = 2 * N * D * D * 12 + 4 * N * N * D
    transcendentals = N * N + N * D                 # softmax exp + gelu tanh
    bytes_accessed = sum(int(op.size) * op.dtype.itemsize for op in operands) + N * D * 4

    kernel = functools.partial(_decoder_kernel, batch=B, e_real=E, eps=1e-5)

    out2d = pl.pallas_call(
        kernel,
        out_shape=jax.ShapeDtypeStruct((N, D), jnp.float32),   # lane-dense output slab
        in_specs=[pl.BlockSpec(memory_space=pltpu.MemorySpace.VMEM)] * len(operands),
        out_specs=pl.BlockSpec(memory_space=pltpu.MemorySpace.VMEM),
        compiler_params=pltpu.CompilerParams(vmem_limit_bytes=16 * 1024 * 1024),
        cost_estimate=pl.CostEstimate(flops=int(flops),
                                      transcendentals=int(transcendentals),
                                      bytes_accessed=int(bytes_accessed)),
    )(*operands)

    return out2d[:, :OUT].reshape(S, B, OUT)


# ---------------------------- deterministic params ----------------------------

def init_params(key, embed_dim=9, dim_feedforward=128, output_dim=9):
    def dense(k, fan_in, fan_out):
        kw, kb = jax.random.split(k)
        bound = 1.0 / math.sqrt(fan_in)
        w = jax.random.uniform(kw, (fan_in, fan_out), jnp.float32, -bound, bound)
        b = jax.random.uniform(kb, (1, fan_out), jnp.float32, -bound, bound)
        return w, b

    keys = jax.random.split(key, 12)
    p = {}
    p["lw1"], p["lb1"] = dense(keys[0], embed_dim, dim_feedforward)
    p["lw2"], p["lb2"] = dense(keys[1], dim_feedforward, dim_feedforward)
    p["lw3"], p["lb3"] = dense(keys[2], dim_feedforward, embed_dim)
    p["wq"], p["bq"] = dense(keys[3], embed_dim, embed_dim)
    p["wk"], p["bk"] = dense(keys[4], embed_dim, embed_dim)
    p["wv"], p["bv"] = dense(keys[5], embed_dim, embed_dim)
    p["wo"], p["bo"] = dense(keys[6], embed_dim, embed_dim)
    p["g1"], p["be1"] = jnp.ones((1, embed_dim), jnp.float32), jnp.zeros((1, embed_dim), jnp.float32)
    p["wf1"], p["bf1"] = dense(keys[7], embed_dim, dim_feedforward)
    p["wf2"], p["bf2"] = dense(keys[8], dim_feedforward, embed_dim)
    p["g2"], p["be2"] = jnp.ones((1, embed_dim), jnp.float32), jnp.zeros((1, embed_dim), jnp.float32)
    p["pw1"], p["pb1"] = dense(keys[9], embed_dim, dim_feedforward)
    p["pw2"], p["pb2"] = dense(keys[10], dim_feedforward, dim_feedforward)
    p["pw3"], p["pb3"] = dense(keys[11], dim_feedforward, output_dim)
    return p


# ------------------------------ pure-JAX reference -----------------------------

def reference_forward(x_sbe, params):
    p = params
    lin = lambda x, w, b: x @ w + b
    ln = lambda x, g, b: ((x - jnp.mean(x, -1, keepdims=True))
                          / jnp.sqrt(jnp.mean((x - jnp.mean(x, -1, keepdims=True)) ** 2,
                                              -1, keepdims=True) + 1e-5) * g + b)
    z = jax.nn.relu(lin(x_sbe, p["lw1"], p["lb1"]))
    z = jax.nn.relu(lin(z, p["lw2"], p["lb2"]))
    z = lin(z, p["lw3"], p["lb3"])
    q, k, v = (lin(z, p["wq"], p["bq"]), lin(z, p["wk"], p["bk"]), lin(z, p["wv"], p["bv"]))
    sc = jnp.einsum("sbe,tbe->bst", q, k) / math.sqrt(z.shape[-1])
    ctx = jnp.einsum("bst,tbe->sbe", jax.nn.softmax(sc, axis=-1), v)
    h = ln(z + lin(ctx, p["wo"], p["bo"]), p["g1"], p["be1"])
    ff = lin(h, p["wf1"], p["bf1"])
    ff = jax.nn.gelu(ff, approximate=False)
    ff = lin(ff, p["wf2"], p["bf2"])
    h = ln(h + ff, p["g2"], p["be2"])
    y = jax.nn.relu(lin(h, p["pw1"], p["pb1"]))
    y = jax.nn.relu(lin(y, p["pw2"], p["pb2"]))
    return lin(y, p["pw3"], p["pb3"])


# ----------------------------------- main --------------------------------------

if __name__ == "__main__":
    S, B = 8, 2                      # seq, batch  (batch_first=False -> x is (S, B, E))
    EMBED, FF, OUT = 9, 128, 9       # embed_dim=9, small dim_feedforward, output_dim=9

    key = jax.random.PRNGKey(0)
    kx, kp = jax.random.split(key)
    params = init_params(kp, embed_dim=EMBED, dim_feedforward=FF, output_dim=OUT)
    packed = pack_params(params, EMBED, FF, OUT)   # pack/pad/bf16-cast once, reuse per call
    x = jax.random.normal(kx, (S, B, EMBED), jnp.float32)

    out = jax.block_until_ready(transformer_decoder_forward(x, packed))
    ref = jax.block_until_ready(reference_forward(x, params))

    assert out.shape == (S, B, OUT), out.shape
    assert bool(jnp.all(jnp.isfinite(out)))
    # Loose tolerance: bf16 weights/activations on the MXU path + approx reciprocal
    # softmax + tanh-form GELU vs. the exact-f32 reference.
    if not jnp.allclose(out, ref, atol=2e-2, rtol=2e-2):
        raise AssertionError(f"mismatch, max abs diff = {jnp.max(jnp.abs(out - ref))}")

    print("KERNEL_OK")
</pallas_src>

<mosaic_0001>
module attributes {stable_mosaic.version = 11 : i64} {
  func.func @_decoder_kernel(%arg0: memref<16x128xf32, #tpu.memory_space<vmem>>, %arg1: memref<9x128x128xbf16, #tpu.memory_space<vmem>>, %arg2: memref<128x384xbf16, #tpu.memory_space<vmem>>, %arg3: memref<14x384xf32, #tpu.memory_space<vmem>>, %arg4: memref<16x128xf32, #tpu.memory_space<vmem>>) attributes {dimension_semantics = [], scalar_prefetch = 0 : i64, scratch_operands = 0 : i64, tpu.core_type = #tpu.core_type<tc>} {
    %0 = tpu.iota {dimensions = array<i32: 1>} : vector<1x128xi32>
    %c9_i32 = arith.constant 9 : i32
    %1 = vector.broadcast %c9_i32 : i32 to vector<1x128xi32>
    %2 = arith.cmpi slt, %0, %1 : vector<1x128xi32>
    %c0 = arith.constant 0 : index
    %c0_0 = arith.constant 0 : index
    %3 = vector.load %arg0[%c0, %c0_0] : memref<16x128xf32, #tpu.memory_space<vmem>>, vector<16x128xf32>
    %c0_1 = arith.constant 0 : index
    %c0_2 = arith.constant 0 : index
    %c0_3 = arith.constant 0 : index
    %4 = vector.load %arg1[%c0_1, %c0_2, %c0_3] : memref<9x128x128xbf16, #tpu.memory_space<vmem>>, vector<1x128x128xbf16>
    %5 = vector.shape_cast %4 : vector<1x128x128xbf16> to vector<128x128xbf16>
    %6 = arith.truncf %3 : vector<16x128xf32> to vector<16x128xbf16>
    %cst = arith.constant dense<0.000000e+00> : vector<16x128xf32>
    %7 = tpu.matmul %6, %5, %cst {dimension_numbers = #tpu.dot_dimension_numbers<[1], [0], [0], [1], [0, 0, 1, 1], [], []>} : vector<16x128xbf16>, vector<128x128xbf16>, vector<16x128xf32> -> vector<16x128xf32>
    %c0_4 = arith.constant 0 : index
    %c0_5 = arith.constant 0 : index
    %8 = vector.load %arg3[%c0_4, %c0_5] : memref<14x384xf32, #tpu.memory_space<vmem>>, vector<1x128xf32>
    %9 = vector.broadcast %8 : vector<1x128xf32> to vector<16x128xf32>
    %10 = arith.addf %7, %9 : vector<16x128xf32>
    %cst_6 = arith.constant 0.000000e+00 : f32
    %11 = vector.broadcast %cst_6 : f32 to vector<16x128xf32>
    %12 = arith.maximumf %10, %11 : vector<16x128xf32>
    %c1 = arith.constant 1 : index
    %c0_7 = arith.constant 0 : index
    %c0_8 = arith.constant 0 : index
    %13 = vector.load %arg1[%c1, %c0_7, %c0_8] : memref<9x128x128xbf16, #tpu.memory_space<vmem>>, vector<1x128x128xbf16>
    %14 = vector.shape_cast %13 : vector<1x128x128xbf16> to vector<128x128xbf16>
    %15 = arith.truncf %12 : vector<16x128xf32> to vector<16x128xbf16>
    %cst_9 = arith.constant dense<0.000000e+00> : vector<16x128xf32>
    %16 = tpu.matmul %15, %14, %cst_9 {dimension_numbers = #tpu.dot_dimension_numbers<[1], [0], [0], [1], [0, 0, 1, 1], [], []>} : vector<16x128xbf16>, vector<128x128xbf16>, vector<16x128xf32> -> vector<16x128xf32>
    %c1_10 = arith.constant 1 : index
    %c0_11 = arith.constant 0 : index
    %17 = vector.load %arg3[%c1_10, %c0_11] : memref<14x384xf32, #tpu.memory_space<vmem>>, vector<1x128xf32>
    %18 = vector.broadcast %17 : vector<1x128xf32> to vector<16x128xf32>
    %19 = arith.addf %16, %18 : vector<16x128xf32>
    %cst_12 = arith.constant 0.000000e+00 : f32
    %20 = vector.broadcast %cst_12 : f32 to vector<16x128xf32>
    %21 = arith.maximumf %19, %20 : vector<16x128xf32>
    %c2 = arith.constant 2 : index
    %c0_13 = arith.constant 0 : index
    %c0_14 = arith.constant 0 : index
    %22 = vector.load %arg1[%c2, %c0_13, %c0_14] : memref<9x128x128xbf16, #tpu.memory_space<vmem>>, vector<1x128x128xbf16>
    %23 = vector.shape_cast %22 : vector<1x128x128xbf16> to vector<128x128xbf16>
    %24 = arith.truncf %21 : vector<16x128xf32> to vector<16x128xbf16>
    %cst_15 = arith.constant dense<0.000000e+00> : vector<16x128xf32>
    %25 = tpu.matmul %24, %23, %cst_15 {dimension_numbers = #tpu.dot_dimension_numbers<[1], [0], [0], [1], [0, 0, 1, 1], [], []>} : vector<16x128xbf16>, vector<128x128xbf16>, vector<16x128xf32> -> vector<16x128xf32>
    %c2_16 = arith.constant 2 : index
    %c0_17 = arith.constant 0 : index
    %26 = vector.load %arg3[%c2_16, %c0_17] : memref<14x384xf32, #tpu.memory_space<vmem>>, vector<1x128xf32>
    %27 = vector.broadcast %26 : vector<1x128xf32> to vector<16x128xf32>
    %28 = arith.addf %25, %27 : vector<16x128xf32>
    %c0_18 = arith.constant 0 : index
    %c0_19 = arith.constant 0 : index
    %29 = vector.load %arg2[%c0_18, %c0_19] : memref<128x384xbf16, #tpu.memory_space<vmem>>, vector<128x384xbf16>
    %30 = arith.truncf %28 : vector<16x128xf32> to vector<16x128xbf16>
    %cst_20 = arith.constant dense<0.000000e+00> : vector<16x384xf32>
    %31 = tpu.matmul %30, %29, %cst_20 {dimension_numbers = #tpu.dot_dimension_numbers<[1], [0], [0], [1], [0, 0, 1, 1], [], []>} : vector<16x128xbf16>, vector<128x384xbf16>, vector<16x384xf32> -> vector<16x384xf32>
    %c3 = arith.constant 3 : index
    %c0_21 = arith.constant 0 : index
    %32 = vector.load %arg3[%c3, %c0_21] : memref<14x384xf32, #tpu.memory_space<vmem>>, vector<1x384xf32>
    %33 = vector.broadcast %32 : vector<1x384xf32> to vector<16x384xf32>
    %34 = arith.addf %31, %33 : vector<16x384xf32>
    %35 = vector.extract_strided_slice %34 {offsets = [0, 0], sizes = [16, 128], strides = [1, 1]} : vector<16x384xf32> to vector<16x128xf32>
    %36 = vector.extract_strided_slice %34 {offsets = [0, 128], sizes = [16, 128], strides = [1, 1]} : vector<16x384xf32> to vector<16x128xf32>
    %37 = vector.extract_strided_slice %34 {offsets = [0, 256], sizes = [16, 128], strides = [1, 1]} : vector<16x384xf32> to vector<16x128xf32>
    %38 = arith.truncf %35 : vector<16x128xf32> to vector<16x128xbf16>
    %39 = arith.truncf %36 : vector<16x128xf32> to vector<16x128xbf16>
    %cst_22 = arith.constant dense<0.000000e+00> : vector<16x16xf32>
    %40 = tpu.matmul %38, %39, %cst_22 {dimension_numbers = #tpu.dot_dimension_numbers<[1], [1], [0], [0], [0, 0, 1, 0], [], []>} : vector<16x128xbf16>, vector<16x128xbf16>, vector<16x16xf32> -> vector<16x16xf32>
    %41 = tpu.iota {dimensions = array<i32: 0>} : vector<16x16xi32>
    %c2_i32 = arith.constant 2 : i32
    %c0_i32 = arith.constant 0 : i32
    %42 = arith.cmpi eq, %c2_i32, %c0_i32 : i32
    %c1_i32 = arith.constant 1 : i32
    %43 = arith.select %42, %c1_i32, %c2_i32 : i32
    %44 = vector.broadcast %43 : i32 to vector<16x16xi32>
    %45 = arith.remsi %41, %44 : vector<16x16xi32>
    %c0_i32_23 = arith.constant 0 : i32
    %46 = vector.broadcast %c0_i32_23 : i32 to vector<16x16xi32>
    %47 = arith.cmpi ne, %45, %46 : vector<16x16xi32>
    %c0_i32_24 = arith.constant 0 : i32
    %48 = vector.broadcast %c0_i32_24 : i32 to vector<16x16xi32>
    %49 = arith.cmpi slt, %45, %48 : vector<16x16xi32>
    %c0_i32_25 = arith.constant 0 : i32
    %50 = arith.cmpi slt, %43, %c0_i32_25 : i32
    %51 = vector.broadcast %50 : i1 to vector<16x16xi1>
    %52 = vector.broadcast %51 : vector<16x16xi1> to vector<16x16xi1>
    %53 = arith.xori %49, %52 : vector<16x16xi1>
    %54 = arith.andi %53, %47 : vector<16x16xi1>
    %55 = vector.broadcast %43 : i32 to vector<16x16xi32>
    %56 = arith.addi %45, %55 : vector<16x16xi32>
    %57 = arith.select %54, %56, %45 : vector<16x16xi1>, vector<16x16xi32>
    %58 = tpu.iota {dimensions = array<i32: 1>} : vector<16x16xi32>
    %c2_i32_26 = arith.constant 2 : i32
    %c0_i32_27 = arith.constant 0 : i32
    %59 = arith.cmpi eq, %c2_i32_26, %c0_i32_27 : i32
    %c1_i32_28 = arith.constant 1 : i32
    %60 = arith.select %59, %c1_i32_28, %c2_i32_26 : i32
    %61 = vector.broadcast %60 : i32 to vector<16x16xi32>
    %62 = arith.remsi %58, %61 : vector<16x16xi32>
    %c0_i32_29 = arith.constant 0 : i32
    %63 = vector.broadcast %c0_i32_29 : i32 to vector<16x16xi32>
    %64 = arith.cmpi ne, %62, %63 : vector<16x16xi32>
    %c0_i32_30 = arith.constant 0 : i32
    %65 = vector.broadcast %c0_i32_30 : i32 to vector<16x16xi32>
    %66 = arith.cmpi slt, %62, %65 : vector<16x16xi32>
    %c0_i32_31 = arith.constant 0 : i32
    %67 = arith.cmpi slt, %60, %c0_i32_31 : i32
    %68 = vector.broadcast %67 : i1 to vector<16x16xi1>
    %69 = vector.broadcast %68 : vector<16x16xi1> to vector<16x16xi1>
    %70 = arith.xori %66, %69 : vector<16x16xi1>
    %71 = arith.andi %70, %64 : vector<16x16xi1>
    %72 = vector.broadcast %60 : i32 to vector<16x16xi32>
    %73 = arith.addi %62, %72 : vector<16x16xi32>
    %74 = arith.select %71, %73, %62 : vector<16x16xi1>, vector<16x16xi32>
    %75 = arith.cmpi eq, %57, %74 : vector<16x16xi32>
    %cst_32 = arith.constant -1.000000e+30 : f32
    %76 = vector.broadcast %cst_32 : f32 to vector<16x16xf32>
    %77 = arith.select %75, %40, %76 : vector<16x16xi1>, vector<16x16xf32>
    %cst_33 = arith.constant dense<0xFF800000> : vector<16xf32>
    %78 = vector.multi_reduction <maximumf>, %77, %cst_33 [1] : vector<16x16xf32> to vector<16xf32>
    %79 = vector.shape_cast %78 : vector<16xf32> to vector<16x1xf32>
    %80 = vector.broadcast %79 : vector<16x1xf32> to vector<16x16xf32>
    %81 = arith.subf %77, %80 : vector<16x16xf32>
    %82 = math.exp %81 : vector<16x16xf32>
    %cst_34 = arith.constant dense<0.000000e+00> : vector<16xf32>
    %83 = vector.multi_reduction <add>, %82, %cst_34 [1] : vector<16x16xf32> to vector<16xf32>
    %84 = vector.shape_cast %83 : vector<16xf32> to vector<16x1xf32>
    %85 = tpu.reciprocal %84 {approx = true} : vector<16x1xf32> -> vector<16x1xf32>
    %86 = vector.broadcast %85 : vector<16x1xf32> to vector<16x16xf32>
    %87 = arith.mulf %82, %86 : vector<16x16xf32>
    %88 = arith.truncf %87 : vector<16x16xf32> to vector<16x16xbf16>
    %89 = arith.truncf %37 : vector<16x128xf32> to vector<16x128xbf16>
    %cst_35 = arith.constant dense<0.000000e+00> : vector<16x128xf32>
    %90 = tpu.matmul %88, %89, %cst_35 {dimension_numbers = #tpu.dot_dimension_numbers<[1], [0], [0], [1], [0, 0, 1, 1], [], []>} : vector<16x16xbf16>, vector<16x128xbf16>, vector<16x128xf32> -> vector<16x128xf32>
    %c3_36 = arith.constant 3 : index
    %c0_37 = arith.constant 0 : index
    %c0_38 = arith.constant 0 : index
    %91 = vector.load %arg1[%c3_36, %c0_37, %c0_38] : memref<9x128x128xbf16, #tpu.memory_space<vmem>>, vector<1x128x128xbf16>
    %92 = vector.shape_cast %91 : vector<1x128x128xbf16> to vector<128x128xbf16>
    %93 = arith.truncf %90 : vector<16x128xf32> to vector<16x128xbf16>
    %cst_39 = arith.constant dense<0.000000e+00> : vector<16x128xf32>
    %94 = tpu.matmul %93, %92, %cst_39 {dimension_numbers = #tpu.dot_dimension_numbers<[1], [0], [0], [1], [0, 0, 1, 1], [], []>} : vector<16x128xbf16>, vector<128x128xbf16>, vector<16x128xf32> -> vector<16x128xf32>
    %c4 = arith.constant 4 : index
    %c0_40 = arith.constant 0 : index
    %95 = vector.load %arg3[%c4, %c0_40] : memref<14x384xf32, #tpu.memory_space<vmem>>, vector<1x128xf32>
    %96 = vector.broadcast %95 : vector<1x128xf32> to vector<16x128xf32>
    %97 = arith.addf %94, %96 : vector<16x128xf32>
    %98 = arith.addf %28, %97 : vector<16x128xf32>
    %cst_41 = arith.constant dense<0.000000e+00> : vector<16xf32>
    %99 = vector.multi_reduction <add>, %98, %cst_41 [1] : vector<16x128xf32> to vector<16xf32>
    %100 = vector.shape_cast %99 : vector<16xf32> to vector<16x1xf32>
    %cst_42 = arith.constant 0.111111112 : f32
    %101 = vector.broadcast %cst_42 : f32 to vector<16x1xf32>
    %102 = arith.mulf %100, %101 : vector<16x1xf32>
    %103 = vector.broadcast %102 : vector<16x1xf32> to vector<16x128xf32>
    %104 = arith.subf %98, %103 : vector<16x128xf32>
    %cst_43 = arith.constant 0.000000e+00 : f32
    %105 = vector.shape_cast %2 : vector<1x128xi1> to vector<1x128xi1>
    %106 = vector.broadcast %105 : vector<1x128xi1> to vector<16x128xi1>
    %107 = vector.broadcast %cst_43 : f32 to vector<16x128xf32>
    %108 = arith.select %106, %104, %107 : vector<16x128xi1>, vector<16x128xf32>
    %109 = arith.mulf %108, %108 : vector<16x128xf32>
    %cst_44 = arith.constant dense<0.000000e+00> : vector<16xf32>
    %110 = vector.multi_reduction <add>, %109, %cst_44 [1] : vector<16x128xf32> to vector<16xf32>
    %111 = vector.shape_cast %110 : vector<16xf32> to vector<16x1xf32>
    %cst_45 = arith.constant 0.111111112 : f32
    %112 = vector.broadcast %cst_45 : f32 to vector<16x1xf32>
    %113 = arith.mulf %111, %112 : vector<16x1xf32>
    %cst_46 = arith.constant 9.99999974E-6 : f32
    %114 = vector.broadcast %cst_46 : f32 to vector<16x1xf32>
    %115 = arith.addf %113, %114 : vector<16x1xf32>
    %116 = math.rsqrt %115 : vector<16x1xf32>
    %117 = vector.broadcast %116 : vector<16x1xf32> to vector<16x128xf32>
    %118 = arith.mulf %108, %117 : vector<16x128xf32>
    %c5 = arith.constant 5 : index
    %c0_47 = arith.constant 0 : index
    %119 = vector.load %arg3[%c5, %c0_47] : memref<14x384xf32, #tpu.memory_space<vmem>>, vector<1x128xf32>
    %120 = vector.broadcast %119 : vector<1x128xf32> to vector<16x128xf32>
    %121 = arith.mulf %118, %120 : vector<16x128xf32>
    %c6 = arith.constant 6 : index
    %c0_48 = arith.constant 0 : index
    %122 = vector.load %arg3[%c6, %c0_48] : memref<14x384xf32, #tpu.memory_space<vmem>>, vector<1x128xf32>
    %123 = vector.broadcast %122 : vector<1x128xf32> to vector<16x128xf32>
    %124 = arith.addf %121, %123 : vector<16x128xf32>
    %c4_49 = arith.constant 4 : index
    %c0_50 = arith.constant 0 : index
    %c0_51 = arith.constant 0 : index
    %125 = vector.load %arg1[%c4_49, %c0_50, %c0_51] : memref<9x128x128xbf16, #tpu.memory_space<vmem>>, vector<1x128x128xbf16>
    %126 = vector.shape_cast %125 : vector<1x128x128xbf16> to vector<128x128xbf16>
    %127 = arith.truncf %124 : vector<16x128xf32> to vector<16x128xbf16>
    %cst_52 = arith.constant dense<0.000000e+00> : vector<16x128xf32>
    %128 = tpu.matmul %127, %126, %cst_52 {dimension_numbers = #tpu.dot_dimension_numbers<[1], [0], [0], [1], [0, 0, 1, 1], [], []>} : vector<16x128xbf16>, vector<128x128xbf16>, vector<16x128xf32> -> vector<16x128xf32>
    %c7 = arith.constant 7 : index
    %c0_53 = arith.constant 0 : index
    %129 = vector.load %arg3[%c7, %c0_53] : memref<14x384xf32, #tpu.memory_space<vmem>>, vector<1x128xf32>
    %130 = vector.broadcast %129 : vector<1x128xf32> to vector<16x128xf32>
    %131 = arith.addf %128, %130 : vector<16x128xf32>
    %cst_54 = arith.constant 5.000000e-01 : f32
    %132 = vector.broadcast %cst_54 : f32 to vector<16x128xf32>
    %133 = arith.mulf %132, %131 : vector<16x128xf32>
    %cst_55 = arith.constant 4.471500e-02 : f32
    %134 = vector.broadcast %cst_55 : f32 to vector<16x128xf32>
    %135 = arith.mulf %134, %131 : vector<16x128xf32>
    %136 = arith.mulf %135, %131 : vector<16x128xf32>
    %137 = arith.mulf %136, %131 : vector<16x128xf32>
    %138 = arith.addf %131, %137 : vector<16x128xf32>
    %cst_56 = arith.constant 0.797884583 : f32
    %139 = vector.broadcast %cst_56 : f32 to vector<16x128xf32>
    %140 = arith.mulf %139, %138 : vector<16x128xf32>
    %141 = math.tanh %140 : vector<16x128xf32>
    %cst_57 = arith.constant 1.000000e+00 : f32
    %142 = vector.broadcast %cst_57 : f32 to vector<16x128xf32>
    %143 = arith.addf %142, %141 : vector<16x128xf32>
    %144 = arith.mulf %133, %143 : vector<16x128xf32>
    %c5_58 = arith.constant 5 : index
    %c0_59 = arith.constant 0 : index
    %c0_60 = arith.constant 0 : index
    %145 = vector.load %arg1[%c5_58, %c0_59, %c0_60] : memref<9x128x128xbf16, #tpu.memory_space<vmem>>, vector<1x128x128xbf16>
    %146 = vector.shape_cast %145 : vector<1x128x128xbf16> to vector<128x128xbf16>
    %147 = arith.truncf %144 : vector<16x128xf32> to vector<16x128xbf16>
    %cst_61 = arith.constant dense<0.000000e+00> : vector<16x128xf32>
    %148 = tpu.matmul %147, %146, %cst_61 {dimension_numbers = #tpu.dot_dimension_numbers<[1], [0], [0], [1], [0, 0, 1, 1], [], []>} : vector<16x128xbf16>, vector<128x128xbf16>, vector<16x128xf32> -> vector<16x128xf32>
    %c8 = arith.constant 8 : index
    %c0_62 = arith.constant 0 : index
    %149 = vector.load %arg3[%c8, %c0_62] : memref<14x384xf32, #tpu.memory_space<vmem>>, vector<1x128xf32>
    %150 = vector.broadcast %149 : vector<1x128xf32> to vector<16x128xf32>
    %151 = arith.addf %148, %150 : vector<16x128xf32>
    %152 = arith.addf %124, %151 : vector<16x128xf32>
    %cst_63 = arith.constant dense<0.000000e+00> : vector<16xf32>
    %153 = vector.multi_reduction <add>, %152, %cst_63 [1] : vector<16x128xf32> to vector<16xf32>
    %154 = vector.shape_cast %153 : vector<16xf32> to vector<16x1xf32>
    %cst_64 = arith.constant 0.111111112 : f32
    %155 = vector.broadcast %cst_64 : f32 to vector<16x1xf32>
    %156 = arith.mulf %154, %155 : vector<16x1xf32>
    %157 = vector.broadcast %156 : vector<16x1xf32> to vector<16x128xf32>
    %158 = arith.subf %152, %157 : vector<16x128xf32>
    %cst_65 = arith.constant 0.000000e+00 : f32
    %159 = vector.shape_cast %2 : vector<1x128xi1> to vector<1x128xi1>
    %160 = vector.broadcast %159 : vector<1x128xi1> to vector<16x128xi1>
    %161 = vector.broadcast %cst_65 : f32 to vector<16x128xf32>
    %162 = arith.select %160, %158, %161 : vector<16x128xi1>, vector<16x128xf32>
    %163 = arith.mulf %162, %162 : vector<16x128xf32>
    %cst_66 = arith.constant dense<0.000000e+00> : vector<16xf32>
    %164 = vector.multi_reduction <add>, %163, %cst_66 [1] : vector<16x128xf32> to vector<16xf32>
    %165 = vector.shape_cast %164 : vector<16xf32> to vector<16x1xf32>
    %cst_67 = arith.constant 0.111111112 : f32
    %166 = vector.broadcast %cst_67 : f32 to vector<16x1xf32>
    %167 = arith.mulf %165, %166 : vector<16x1xf32>
    %cst_68 = arith.constant 9.99999974E-6 : f32
    %168 = vector.broadcast %cst_68 : f32 to vector<16x1xf32>
    %169 = arith.addf %167, %168 : vector<16x1xf32>
    %170 = math.rsqrt %169 : vector<16x1xf32>
    %171 = vector.broadcast %170 : vector<16x1xf32> to vector<16x128xf32>
    %172 = arith.mulf %162, %171 : vector<16x128xf32>
    %c9 = arith.constant 9 : index
    %c0_69 = arith.constant 0 : index
    %173 = vector.load %arg3[%c9, %c0_69] : memref<14x384xf32, #tpu.memory_space<vmem>>, vector<1x128xf32>
    %174 = vector.broadcast %173 : vector<1x128xf32> to vector<16x128xf32>
    %175 = arith.mulf %172, %174 : vector<16x128xf32>
    %c10 = arith.constant 10 : index
    %c0_70 = arith.constant 0 : index
    %176 = vector.load %arg3[%c10, %c0_70] : memref<14x384xf32, #tpu.memory_space<vmem>>, vector<1x128xf32>
    %177 = vector.broadcast %176 : vector<1x128xf32> to vector<16x128xf32>
    %178 = arith.addf %175, %177 : vector<16x128xf32>
    %c6_71 = arith.constant 6 : index
    %c0_72 = arith.constant 0 : index
    %c0_73 = arith.constant 0 : index
    %179 = vector.load %arg1[%c6_71, %c0_72, %c0_73] : memref<9x128x128xbf16, #tpu.memory_space<vmem>>, vector<1x128x128xbf16>
    %180 = vector.shape_cast %179 : vector<1x128x128xbf16> to vector<128x128xbf16>
    %181 = arith.truncf %178 : vector<16x128xf32> to vector<16x128xbf16>
    %cst_74 = arith.constant dense<0.000000e+00> : vector<16x128xf32>
    %182 = tpu.matmul %181, %180, %cst_74 {dimension_numbers = #tpu.dot_dimension_numbers<[1], [0], [0], [1], [0, 0, 1, 1], [], []>} : vector<16x128xbf16>, vector<128x128xbf16>, vector<16x128xf32> -> vector<16x128xf32>
    %c11 = arith.constant 11 : index
    %c0_75 = arith.constant 0 : index
    %183 = vector.load %arg3[%c11, %c0_75] : memref<14x384xf32, #tpu.memory_space<vmem>>, vector<1x128xf32>
    %184 = vector.broadcast %183 : vector<1x128xf32> to vector<16x128xf32>
    %185 = arith.addf %182, %184 : vector<16x128xf32>
    %cst_76 = arith.constant 0.000000e+00 : f32
    %186 = vector.broadcast %cst_76 : f32 to vector<16x128xf32>
    %187 = arith.maximumf %185, %186 : vector<16x128xf32>
    %c7_77 = arith.constant 7 : index
    %c0_78 = arith.constant 0 : index
    %c0_79 = arith.constant 0 : index
    %188 = vector.load %arg1[%c7_77, %c0_78, %c0_79] : memref<9x128x128xbf16, #tpu.memory_space<vmem>>, vector<1x128x128xbf16>
    %189 = vector.shape_cast %188 : vector<1x128x128xbf16> to vector<128x128xbf16>
    %190 = arith.truncf %187 : vector<16x128xf32> to vector<16x128xbf16>
    %cst_80 = arith.constant dense<0.000000e+00> : vector<16x128xf32>
    %191 = tpu.matmul %190, %189, %cst_80 {dimension_numbers = #tpu.dot_dimension_numbers<[1], [0], [0], [1], [0, 0, 1, 1], [], []>} : vector<16x128xbf16>, vector<128x128xbf16>, vector<16x128xf32> -> vector<16x128xf32>
    %c12 = arith.constant 12 : index
    %c0_81 = arith.constant 0 : index
    %192 = vector.load %arg3[%c12, %c0_81] : memref<14x384xf32, #tpu.memory_space<vmem>>, vector<1x128xf32>
    %193 = vector.broadcast %192 : vector<1x128xf32> to vector<16x128xf32>
    %194 = arith.addf %191, %193 : vector<16x128xf32>
    %cst_82 = arith.constant 0.000000e+00 : f32
    %195 = vector.broadcast %cst_82 : f32 to vector<16x128xf32>
    %196 = arith.maximumf %194, %195 : vector<16x128xf32>
    %c8_83 = arith.constant 8 : index
    %c0_84 = arith.constant 0 : index
    %c0_85 = arith.constant 0 : index
    %197 = vector.load %arg1[%c8_83, %c0_84, %c0_85] : memref<9x128x128xbf16, #tpu.memory_space<vmem>>, vector<1x128x128xbf16>
    %198 = vector.shape_cast %197 : vector<1x128x128xbf16> to vector<128x128xbf16>
    %199 = arith.truncf %196 : vector<16x128xf32> to vector<16x128xbf16>
    %cst_86 = arith.constant dense<0.000000e+00> : vector<16x128xf32>
    %200 = tpu.matmul %199, %198, %cst_86 {dimension_numbers = #tpu.dot_dimension_numbers<[1], [0], [0], [1], [0, 0, 1, 1], [], []>} : vector<16x128xbf16>, vector<128x128xbf16>, vector<16x128xf32> -> vector<16x128xf32>
    %c13 = arith.constant 13 : index
    %c0_87 = arith.constant 0 : index
    %201 = vector.load %arg3[%c13, %c0_87] : memref<14x384xf32, #tpu.memory_space<vmem>>, vector<1x128xf32>
    %202 = vector.broadcast %201 : vector<1x128xf32> to vector<16x128xf32>
    %203 = arith.addf %200, %202 : vector<16x128xf32>
    %c0_88 = arith.constant 0 : index
    %c0_89 = arith.constant 0 : index
    %204 = vector.load %arg4[%c0_88, %c0_89] : memref<16x128xf32, #tpu.memory_space<vmem>>, vector<16x128xf32>
    tpu.vector_store %arg4[%c0_88, %c0_89], %203 {strides = array<i32>} : memref<16x128xf32, #tpu.memory_space<vmem>>, vector<16x128xf32>,
    return
  }
}

</mosaic_0001>

<bundles_post_ra>
// kernel: tpu_custom_call.1
= control target key start
LH: loop header
LB: loop body
LE: loop exit
PB: predicated region body
PF: predicated region fallthrough
CT: control target
= control target key end

     0   :  { %9 = vsyncpa [#allocation3], 0  ;;  %s2488_s0 = inlined_call_operand.hbm [shape: f32[16,128], index: 0, kind: input, shape index: {}]   ;;  %s2489_s1 = inlined_call_operand.hbm [shape: bf16[9,128,128], index: 1, kind: input, shape index: {}]   ;;  %s2490_s2 = inlined_call_operand.hbm [shape: bf16[128,384], index: 2, kind: input, shape index: {}]   ;;  %s2491_s3 = inlined_call_operand.hbm [shape: f32[14,384], index: 3, kind: input, shape index: {}]   ;;  %s2492_s4 = inlined_call_operand.hbm [shape: f32[16,128], index: 4, kind: output, shape index: {}]  }
   0x1   :  { %10 = vsyncpa [#allocation6], 0 }
   0x2   :  { %11 = vsyncpa [#allocation9], 0 }
   0x3   :  { %12 = vsyncpa [#allocation4], 0  ;;  %s2242_s15 = smov [#allocation5]   ;;  %s2124_s19 = scalar_lea.hbm %s2489_s1, 9216 }
   0x4   :  { %s30_s16 = sshll.u32 %s2242_s15, 4  ;;  %p2125_p0 = scmp.ne.s32.totalorder %s2489_s1, %s2124_s19  ;;  %s31_s16 = int_to_ptr.vmem [resolvable:$true] %s30_s16 }
   0x5   :  { %p2128_p1 = scmp.lt.u32.totalorder %s2124_s19, %s2489_s1 }
   0x7   :  { %p2130_p2 = pnand %p2128_p1, %p2125_p0 }
   0x9   :  { %2133 = shalt.err (!%p2130_p2)
}
   0xa   :  { %s2134_s24 = scalar_lea.vmem %s31_s16, 9216  ;;  %p2139_p4 = scmp.lt.s32.totalorder %s31_s16, %s31_s16 }
   0xb   :  { %p2135_p3 = scmp.ne.s32.totalorder %s31_s16, %s2134_s24  ;;  %p2140_p5 = scmp.lt.s32.totalorder %s2134_s24, %s2134_s24 }
   0xd   :  { %p2141_p6 = por %p2140_p5, %p2139_p4 }
   0xf   :  { %p2142_p7 = pnand %p2141_p6, %p2135_p3 }
  0x11   :  { %2145 = shalt.err (!%p2142_p7)
}
  0x12   :  { %s2243_s25 = smov 64   ;;  %s2244_s26 = smov 4  }
  0x13   :  { %36 = dma.hbm_to_vmem [thread:$0]  %s2489_s1, 9216, %s31_s16, [#allocation6], %s2243_s25, %s2243_s25, %s2244_s26  }
  0x14   :  { %s2245_s29 = smov [#allocation2]   ;;  %s2146_s7 = scalar_lea.hbm %s2488_s0, 256 }
  0x15   :  { %s18_s30 = sshll.u32 %s2245_s29, 4  ;;  %p2147_p8 = scmp.ne.s32.totalorder %s2488_s0, %s2146_s7  ;;  %s19_s30 = int_to_ptr.vmem [resolvable:$true] %s18_s30 }
  0x16   :  { %p2150_p9 = scmp.lt.u32.totalorder %s2146_s7, %s2488_s0 }
  0x18   :  { %p2152_p10 = pnand %p2150_p9, %p2147_p8 }
  0x1a   :  { %2155 = shalt.err (!%p2152_p10)
}
  0x1b   :  { %s2156_s12 = scalar_lea.vmem %s19_s30, 256  ;;  %p2161_p12 = scmp.lt.s32.totalorder %s19_s30, %s19_s30 }
  0x1c   :  { %p2157_p11 = scmp.ne.s32.totalorder %s19_s30, %s2156_s12  ;;  %p2162_p13 = scmp.lt.s32.totalorder %s2156_s12, %s2156_s12 }
  0x1e   :  { %p2163_p0 = por %p2162_p13, %p2161_p12 }
  0x20   :  { %p2164_p1 = pnand %p2163_p0, %p2157_p11 }
  0x22   :  { %2167 = shalt.err (!%p2164_p1)
}
  0x23   :  { %s2246_s1 = smov 128   ;;  %s2247_s13 = smov 8  }
  0x24   :  { %24 = dma.hbm_to_vmem [thread:$0]  %s2488_s0, 256, %s19_s30, [#allocation3], %s2246_s1, %s2246_s1, %s2247_s13  }
  0x25   :  { %s2248_s16 = smov [#allocation7]   ;;  %s2168_s20 = scalar_lea.hbm %s2490_s2, 3072 }
  0x26   :  { %s42_s17 = sshll.u32 %s2248_s16, 4  ;;  %p2169_p2 = scmp.ne.s32.totalorder %s2490_s2, %s2168_s20  ;;  %s43_s17 = int_to_ptr.vmem [resolvable:$true] %s42_s17 }
  0x27   :  { %p2172_p3 = scmp.lt.u32.totalorder %s2168_s20, %s2490_s2 }
  0x29   :  { %p2174_p4 = pnand %p2172_p3, %p2169_p2 }
  0x2b   :  { %2177 = shalt.err (!%p2174_p4)
}
  0x2c   :  { %s2178_s25 = scalar_lea.vmem %s43_s17, 3072  ;;  %p2183_p6 = scmp.lt.s32.totalorder %s43_s17, %s43_s17 }
  0x2d   :  { %p2179_p5 = scmp.ne.s32.totalorder %s43_s17, %s2178_s25  ;;  %p2184_p7 = scmp.lt.s32.totalorder %s2178_s25, %s2178_s25 }
  0x2f   :  { %p2185_p8 = por %p2184_p7, %p2183_p6 }
  0x31   :  { %p2186_p9 = pnand %p2185_p8, %p2179_p5 }
  0x33   :  { %2189 = shalt.err (!%p2186_p9)
}
  0x34   :  { %s2249_s0 = smov 192   ;;  %s2250_s26 = smov 12  }
  0x35   :  { %48 = dma.hbm_to_vmem [thread:$0]  %s2490_s2, 3072, %s43_s17, [#allocation6], %s2249_s0, %s2249_s0, %s2250_s26  }
  0x36   :  { %s2251_s29 = smov [#allocation8]   ;;  %s2190_s7 = scalar_lea.hbm %s2491_s3, 768 }
  0x37   :  { %s54_s30 = sshll.u32 %s2251_s29, 4  ;;  %p2191_p10 = scmp.ne.s32.totalorder %s2491_s3, %s2190_s7  ;;  %s55_s30 = int_to_ptr.vmem [resolvable:$true] %s54_s30 }
  0x38   :  { %p2194_p11 = scmp.lt.u32.totalorder %s2190_s7, %s2491_s3 }
  0x3a   :  { %p2196_p12 = pnand %p2194_p11, %p2191_p10 }
  0x3c   :  { %2199 = shalt.err (!%p2196_p12)
}
  0x3d   :  { %s2200_s12 = scalar_lea.vmem %s55_s30, 768  ;;  %p2205_p0 = scmp.lt.s32.totalorder %s55_s30, %s55_s30 }
  0x3e   :  { %p2201_p13 = scmp.ne.s32.totalorder %s55_s30, %s2200_s12  ;;  %p2206_p1 = scmp.lt.s32.totalorder %s2200_s12, %s2200_s12 }
  0x40   :  { %p2207_p2 = por %p2206_p1, %p2205_p0 }
  0x42   :  { %p2208_p3 = pnand %p2207_p2, %p2201_p13 }
  0x44   :  { %2211 = shalt.err (!%p2208_p3)
}
  0x45   :  { %s2252_s2 = smov 384   ;;  %s2253_s14 = smov 24  }
  0x46   :  { %60 = dma.hbm_to_vmem [thread:$0]  %s2491_s3, 768, %s55_s30, [#allocation9], %s2252_s2, %s2252_s2, %s2253_s14  }
  0x47   :  { %2234 = dma.done.wait [#allocation3], 256  }
  0x48   :  { %2235 = vsyncadd [#allocation3], 4294967040 }
  0x49   :  { %2236 = dma.done.wait [#allocation6], 12288  }
  0x4a   :  { %2237 = vsyncadd [#allocation6], 4294955008 }
  0x4b   :  { %2238 = dma.done.wait [#allocation9], 768  }
  0x4c   :  { %2239 = vsyncadd [#allocation9], 4294966528  ;;  %v2254_v0 = vmov 0.0   ;;  %vm2255_vm0 = vmmov 0   ;;  %v2000_v1 = vld [vmem:[#allocation5] sm:$0xff]   ;;  %v2001_v2 = vld [vmem:[#allocation5 + $0x8] sm:$0xff]  }
  0x4d   :  { %1772 = vmatprep.subr.bf16.mxu0 %v2254_v0  ;;  %1788 = vmatprep.mubr.msk.bf16.mxu0 %vm2255_vm0, %v2254_v0  ;;  %v2002_v3 = vld [vmem:[#allocation5 + $0x10] sm:$0xff]   ;;  %v2008_v4 = vld [vmem:[#allocation5 + $0x40] sm:$0xff]   ;;  %v2003_v5 = vld [vmem:[#allocation5 + $0x18] sm:$0xff]   ;;  %vm755_vm2 = vcmask 130048   ;;  %s2257_s3 = smov [#allocation10]  }
  0x4e   :  { %1792 = vmatprep.subr.bf16.mxu1 %v2254_v0  ;;  %1808 = vmatprep.mubr.msk.bf16.mxu1 %vm2255_vm0, %v2254_v0  ;;  %v2009_v6 = vld [vmem:[#allocation5 + $0x48] sm:$0xff]   ;;  %v2004_v7 = vld [vmem:[#allocation5 + $0x20] sm:$0xff]   ;;  %v2010_v8 = vld [vmem:[#allocation5 + $0x50] sm:$0xff]   ;;  %s1567_s17 = sshll.u32 %s2257_s3, 4  ;;  %s1568_s17 = int_to_ptr.vmem [resolvable:$true] %s1567_s17 }
  0x4f   :  { %1773 = vmatpush3.bf16.msra.mxu0 %v2000_v1  ;;  %1793 = vmatpush3.bf16.msra.mxu1 %v2008_v4  ;;  %v2005_v9 = vld [vmem:[#allocation5 + $0x28] sm:$0xff]   ;;  %v2011_v10 = vld [vmem:[#allocation5 + $0x58] sm:$0xff]   ;;  %v2006_v11 = vld [vmem:[#allocation5 + $0x30] sm:$0xff]   ;;  %s2212_s18 = scalar_lea.vmem %s1568_s17, 256  ;;  %p2217_p5 = scmp.lt.s32.totalorder %s1568_s17, %s1568_s17 }
  0x50   :  { %1774 = vmatprep.subr.bf16.mxu0 %v2254_v0  ;;  %1794 = vmatprep.subr.bf16.mxu1 %v2254_v0  ;;  %v2012_v12 = vld [vmem:[#allocation5 + $0x60] sm:$0xff]   ;;  %v2007_v13 = vld [vmem:[#allocation5 + $0x38] sm:$0xff]   ;;  %v77_v14 = vld [vmem:[#allocation2] sm:$0xff]  ;;  %p2213_p4 = scmp.ne.s32.totalorder %s1568_s17, %s2212_s18  ;;  %p2218_p6 = scmp.lt.s32.totalorder %s2212_s18, %s2212_s18 }
  0x51   :  { %v78_v15 = vld [vmem:[#allocation2 + $0x8] sm:$0xff]  ;;  %v2013_v16 = vld [vmem:[#allocation5 + $0x68] sm:$0xff]   ;;  %v2014_v18 = vld [vmem:[#allocation5 + $0x70] sm:$0xff]  }
  0x52   :  { %v95_v17 = vpack.c.bf16 %v78_v15, %v77_v14  ;;  %v2015_v19 = vld [vmem:[#allocation5 + $0x78] sm:$0xff]   ;;  %v2016_v20 = vld [vmem:[#allocation5 + $0x80] sm:$0xff]   ;;  %v2017_v21 = vld [vmem:[#allocation5 + $0x88] sm:$0xff]   ;;  %p2219_p7 = por %p2218_p6, %p2217_p5 }
  0x53   :  { %1775 = vmatpush3.bf16.msra.mxu0 %v2001_v2  ;;  %1795 = vmatpush3.bf16.msra.mxu1 %v2009_v6  ;;  %v2018_v22 = vld [vmem:[#allocation5 + $0x90] sm:$0xff]   ;;  %v2019_v23 = vld [vmem:[#allocation5 + $0x98] sm:$0xff]   ;;  %v2020_v24 = vld [vmem:[#allocation5 + $0xa0] sm:$0xff]  }
  0x54   :  { %1776 = vmatprep.subr.bf16.mxu0 %v2254_v0  ;;  %1796 = vmatprep.subr.bf16.mxu1 %v2254_v0  ;;  %v2021_v25 = vld [vmem:[#allocation5 + $0xa8] sm:$0xff]   ;;  %v96_v26 = vld [vmem:[#allocation8] ss:$0 sm:$0xff]  ;;  %v2022_v36 = vld [vmem:[#allocation5 + $0xb0] sm:$0xff]   ;;  %p2220_p8 = pnand %p2219_p7, %p2213_p4 }
  0x55   :  { %v2023_v37 = vld [vmem:[#allocation5 + $0xb8] sm:$0xff]   ;;  %v2024_v38 = vld [vmem:[#allocation7] ss:$12 sps:$4 sm:$0xff]   ;;  %v2026_v39 = vld [vmem:[#allocation7 + $0x4] ss:$12 sps:$4 sm:$0xff]  }
  0x56   :  { %v2030_v40 = vld [vmem:[#allocation7 + $0x1c] ss:$12 sps:$4 sm:$0xff]   ;;  %v2028_v41 = vld [vmem:[#allocation7 + $0x18] ss:$12 sps:$4 sm:$0xff]   ;;  %v2034_v42 = vld [vmem:[#allocation7 + $0x34] ss:$12 sps:$4 sm:$0xff]  }
  0x57   :  { %1777 = vmatpush3.bf16.msra.mxu0 %v2002_v3  ;;  %1797 = vmatpush3.bf16.msra.mxu1 %v2010_v8  ;;  %v2032_v43 = vld [vmem:[#allocation7 + $0x30] ss:$12 sps:$4 sm:$0xff]   ;;  %v2038_v44 = vld [vmem:[#allocation7 + $0x4c] ss:$12 sps:$4 sm:$0xff]   ;;  %v2036_v45 = vld [vmem:[#allocation7 + $0x48] ss:$12 sps:$4 sm:$0xff]  }
  0x58   :  { %1778 = vmatprep.subr.bf16.mxu0 %v2254_v0  ;;  %1798 = vmatprep.subr.bf16.mxu1 %v2254_v0  ;;  %v2042_v46 = vld [vmem:[#allocation7 + $0x64] ss:$12 sps:$4 sm:$0xff]   ;;  %v2040_v47 = vld [vmem:[#allocation7 + $0x60] ss:$12 sps:$4 sm:$0xff]   ;;  %v2046_v48 = vld [vmem:[#allocation7 + $0x7c] ss:$12 sps:$4 sm:$0xff]  }
  0x59   :  { %v2044_v49 = vld [vmem:[#allocation7 + $0x78] ss:$12 sps:$4 sm:$0xff]   ;;  %v2050_v50 = vld [vmem:[#allocation7 + $0x94] ss:$12 sps:$4 sm:$0xff]   ;;  %v2048_v51 = vld [vmem:[#allocation7 + $0x90] ss:$12 sps:$4 sm:$0xff]  }
  0x5a   :  { %v206_v52 = vld [vmem:[#allocation8 + $0x1] ss:$0 sm:$0xff]  ;;  %v2027_v61 = vld [vmem:[#allocation7 + $0x8] ss:$12 sps:$4 sm:$0xff]   ;;  %v2035_v1 = vld [vmem:[#allocation7 + $0x38] ss:$12 sps:$4 sm:$0xff]  }
  0x5b   :  { %1779 = vmatpush3.bf16.msra.mxu0 %v2003_v5  ;;  %1799 = vmatpush3.bf16.msra.mxu1 %v2011_v10  ;;  %v2031_v63 = vld [vmem:[#allocation7 + $0x20] ss:$12 sps:$4 sm:$0xff]   ;;  %v2039_v2 = vld [vmem:[#allocation7 + $0x50] ss:$12 sps:$4 sm:$0xff]   ;;  %v2043_v3 = vld [vmem:[#allocation7 + $0x68] ss:$12 sps:$4 sm:$0xff]  }
  0x5c   :  { %1780 = vmatprep.subr.bf16.mxu0 %v2254_v0  ;;  %1800 = vmatprep.subr.bf16.mxu1 %v2254_v0  ;;  %v2047_v4 = vld [vmem:[#allocation7 + $0x80] ss:$12 sps:$4 sm:$0xff]   ;;  %v2051_v5 = vld [vmem:[#allocation7 + $0x98] ss:$12 sps:$4 sm:$0xff]   ;;  %v2055_v8 = vld [vmem:[#allocation7 + $0xb0] ss:$12 sps:$4 sm:$0xff]  }
  0x5d   :  { %v2054_v6 = vld [vmem:[#allocation7 + $0xac] ss:$12 sps:$4 sm:$0xff]   ;;  %v316_v10 = vld [vmem:[#allocation8 + $0x2] ss:$0 sm:$0xff] }
  0x5f   :  { %1781 = vmatpush3.bf16.msra.mxu0 %v2004_v7  ;;  %1801 = vmatpush3.bf16.msra.mxu1 %v2012_v12  ;;  %v2052_v7 = vld [vmem:[#allocation7 + $0xa8] ss:$12 sps:$4 sm:$0xff]  }
  0x60   :  { %1782 = vmatprep.subr.bf16.mxu0 %v2254_v0  ;;  %1802 = vmatprep.subr.bf16.mxu1 %v2254_v0 }
  0x63   :  { %1783 = vmatpush3.bf16.msra.mxu0 %v2005_v9  ;;  %1803 = vmatpush3.bf16.msra.mxu1 %v2013_v16  ;;  %v2256_v9 = vmov 0  }
  0x64   :  { %1784 = vmatprep.subr.bf16.mxu0 %v2254_v0  ;;  %1804 = vmatprep.subr.bf16.mxu1 %v2254_v0 }
  0x67   :  { %1785 = vmatpush3.bf16.msra.mxu0 %v2006_v11  ;;  %1805 = vmatpush3.bf16.msra.mxu1 %v2014_v18  ;;  %v74_v18 = vlaneseq }
  0x68   :  { %1786 = vmatprep.subr.bf16.mxu0 %v2254_v0  ;;  %1806 = vmatprep.subr.bf16.mxu1 %v2254_v0 }
  0x6b   :  { %1787 = vmatpush3.bf16.msra.mxu0 %v2007_v13  ;;  %1807 = vmatpush3.bf16.msra.mxu1 %v2015_v19  ;;  %v443_v19 = vshrl.u32 %v74_v18, 7 }
  0x6c   :  { %1812 = vmatprep.subr.bf16.mxu0 %v2254_v0  ;;  %585 = vmatprep.subr.bf16.mxu1 %v2026_v39 }
  0x6e   :  { %1789 = vmatmul.mubr.bf16.vlgmr.msra.gmra.mrb[0].mxu0 %v95_v17 }
  0x6f   :  { %1828 = vmatprep.mubr.msk.bf16.mxu0 %vm2255_vm0, %v2254_v0  ;;  %1813 = vmatpush3.bf16.msra.mxu0 %v2016_v20  ;;  %v444_v20 = vsub.s32 0, %v443_v19 }
  0x70   :  { %1814 = vmatprep.subr.bf16.mxu0 %v2254_v0 }
  0x73   :  { %1815 = vmatpush3.bf16.msra.mxu0 %v2017_v21  ;;  %v452_v21 = vsub.s32 2, %v443_v19 }
  0x74   :  { %1816 = vmatprep.subr.bf16.mxu0 %v2254_v0 }
  0x77   :  { %1817 = vmatpush3.bf16.msra.mxu0 %v2018_v22  ;;  %v440_v22 = vld [vmem:[#allocation8 + $0x3] ss:$8 sm:$0x7] }
  0x78   :  { %1818 = vmatprep.subr.bf16.mxu0 %v2254_v0 }
  0x7b   :  { %1819 = vmatpush3.bf16.msra.mxu0 %v2019_v23  ;;  %v448_v23 = vsub.s32 1, %v443_v19 }
  0x7c   :  { %1820 = vmatprep.subr.bf16.mxu0 %v2254_v0 }
  0x7f   :  { %1821 = vmatpush3.bf16.msra.mxu0 %v2020_v24  ;;  %v445_v24 = vrot.slane %v440_v22, %v444_v20  ;;  %v2063_v20 = vld [vmem:[#allocation5 + $0xf8] sm:$0xff]  }
  0x80   :  { %1822 = vmatprep.subr.bf16.mxu0 %v2254_v0 }
  0x83   :  { %1823 = vmatpush3.bf16.msra.mxu0 %v2021_v25  ;;  %v453_v25 = vrot.slane %v440_v22, %v452_v21 }
  0x84   :  { %1824 = vmatprep.subr.bf16.mxu0 %v2254_v0 }
  0x87   :  { %1825 = vmatpush3.bf16.msra.mxu0 %v2022_v36 }
  0x88   :  { %1826 = vmatprep.subr.bf16.mxu0 %v2254_v0 }
  0x8b   :  { %1827 = vmatpush3.bf16.msra.mxu0 %v2023_v37 }
  0x8c   :  { %1832 = vmatprep.subr.bf16.mxu0 %v2254_v0 }
 0x141   :  { %v179_v27 = vpop.f32.mrb[0].mxu0 }
 0x142   :  { %v180_v28 = vadd.f32 %v179_v27, %v96_v26  ;;  %v1790_v29 = vpop.f32.mrb[1].mxu0 }
 0x143   :  { %v182_v30 = vpop.f32.mrb[2].mxu0 }
 0x144   :  { %v183_v31 = vadd.f32 %v182_v30, %v96_v26  ;;  %v1791_v32 = vpop.f32.mrb[3].mxu0  ;;  %v186_v33 = vmax.f32 %v180_v28, 0.0  ;;  %v449_v28 = vrot.slane %v440_v22, %v448_v23 }
 0x146   :  { %v187_v34 = vmax.f32 %v183_v31, 0.0 }
 0x148   :  { %v205_v35 = vpack.c.bf16 %v187_v34, %v186_v33 }
 0x14a   :  { %1809 = vmatmul.mubr.bf16.vlgmr.msra.gmra.mrb[0].mxu1 %v205_v35 }
 0x14b   :  { %586 = vmatpush1.bf16.msra.mxu1 %v2024_v38  ;;  %617 = vmatprep.mubr.bf16.mxu1 %v2256_v9 }
 0x14c   :  { %587 = vmatprep.subr.bf16.mxu1 %v2030_v40 }
 0x14f   :  { %588 = vmatpush1.bf16.msra.mxu1 %v2028_v41 }
 0x150   :  { %589 = vmatprep.subr.bf16.mxu1 %v2034_v42 }
 0x153   :  { %590 = vmatpush1.bf16.msra.mxu1 %v2032_v43 }
 0x154   :  { %591 = vmatprep.subr.bf16.mxu1 %v2038_v44  ;;  %v2390_v44 = vand.u32 127, %v74_v18  ;;  %v2061_v18 = vld [vmem:[#allocation5 + $0xe8] sm:$0xff]  }
 0x156   :  { %vm76_vm4 = vcmp.lt.s32.totalorder %v2390_v44, 9 }
 0x157   :  { %592 = vmatpush1.bf16.msra.mxu1 %v2036_v45  ;;  %v714_v45 = vadd.s32 8, %v443_v19 }
 0x158   :  { %593 = vmatprep.subr.bf16.mxu1 %v2042_v46  ;;  %v719_v46 = vand.u32 1, %v443_v19  ;;  %v2062_v19 = vld [vmem:[#allocation5 + $0xf0] sm:$0xff]  }
 0x15b   :  { %594 = vmatpush1.bf16.msra.mxu1 %v2040_v47  ;;  %v743_v47 = vand.u32 1, %v2390_v44  ;;  %v2086_v44 = vld [vmem:[#allocation5 + $0x1b0] sm:$0xff]  }
 0x15c   :  { %595 = vmatprep.subr.bf16.mxu1 %v2046_v48  ;;  %v726_v48 = vand.u32 1, %v714_v45 }
 0x15d   :  { %vm751_vm1 = vcmp.eq.s32.totalorder %v719_v46, %v743_v47  ;;  %v2066_v46 = vld [vmem:[#allocation5 + $0x110] sm:$0xff]  }
 0x15e   :  { %vm752_vm3 = vcmp.eq.s32.totalorder %v726_v48, %v743_v47  ;;  %v2067_v47 = vld [vmem:[#allocation5 + $0x118] sm:$0xff]   ;;  %v2068_v48 = vld [vmem:[#allocation5 + $0x120] sm:$0xff]  }
 0x15f   :  { %596 = vmatpush1.bf16.msra.mxu1 %v2044_v49 }
 0x160   :  { %597 = vmatprep.subr.bf16.mxu1 %v2050_v50 }
 0x163   :  { %598 = vmatpush1.bf16.msra.mxu1 %v2048_v51 }
 0x164   :  { %599 = vmatprep.subr.bf16.mxu1 %v2054_v6 }
 0x167   :  { %600 = vmatpush1.bf16.msra.mxu1 %v2052_v7 }
 0x168   :  { %1852 = vmatprep.subr.bf16.mxu1 %v2254_v0 }
 0x21d   :  { %v289_v53 = vpop.f32.mrb[0].mxu1 }
 0x21e   :  { %v290_v54 = vadd.f32 %v289_v53, %v206_v52  ;;  %v1810_v55 = vpop.f32.mrb[1].mxu1 }
 0x21f   :  { %v292_v56 = vpop.f32.mrb[2].mxu1 }
 0x220   :  { %v293_v57 = vadd.f32 %v292_v56, %v206_v52  ;;  %v1811_v58 = vpop.f32.mrb[3].mxu1  ;;  %v296_v59 = vmax.f32 %v290_v54, 0.0 }
 0x222   :  { %v297_v60 = vmax.f32 %v293_v57, 0.0 }
 0x224   :  { %v315_v62 = vpack.c.bf16 %v297_v60, %v296_v59 }
 0x226   :  { %1829 = vmatmul.mubr.bf16.vlgmr.msra.gmra.mrb[4].mxu0 %v315_v62 }
 0x227   :  { %1833 = vmatpush3.bf16.msra.mxu0 %v2027_v61  ;;  %1848 = vmatprep.mubr.msk.bf16.mxu0 %vm2255_vm0, %v2254_v0 }
 0x228   :  { %1834 = vmatprep.subr.bf16.mxu0 %v2254_v0 }
 0x22b   :  { %1835 = vmatpush3.bf16.msra.mxu0 %v2031_v63 }
 0x22c   :  { %1836 = vmatprep.subr.bf16.mxu0 %v2254_v0 }
 0x22f   :  { %1837 = vmatpush3.bf16.msra.mxu0 %v2035_v1 }
 0x230   :  { %1838 = vmatprep.subr.bf16.mxu0 %v2254_v0 }
 0x233   :  { %1839 = vmatpush3.bf16.msra.mxu0 %v2039_v2 }
 0x234   :  { %1840 = vmatprep.subr.bf16.mxu0 %v2254_v0 }
 0x237   :  { %1841 = vmatpush3.bf16.msra.mxu0 %v2043_v3 }
 0x238   :  { %1842 = vmatprep.subr.bf16.mxu0 %v2254_v0 }
 0x23b   :  { %1843 = vmatpush3.bf16.msra.mxu0 %v2047_v4 }
 0x23c   :  { %1844 = vmatprep.subr.bf16.mxu0 %v2254_v0 }
 0x23f   :  { %1845 = vmatpush3.bf16.msra.mxu0 %v2051_v5 }
 0x240   :  { %1846 = vmatprep.subr.bf16.mxu0 %v2254_v0 }
 0x243   :  { %1847 = vmatpush3.bf16.msra.mxu0 %v2055_v8 }
 0x244   :  { %1884 = vmatprep.subr.bf16.mxu0 %v2254_v0 }
 0x2f9   :  { %v399_v11 = vpop.f32.mrb[4].mxu0 }
 0x2fa   :  { %v1830_v12 = vpop.f32.mrb[5].mxu0  ;;  %v2376_v14 = vadd.f32 %v399_v11, %v316_v10 }
 0x2fb   :  { %v402_v13 = vpop.f32.mrb[6].mxu0  ;;  %v2057_v12 = vld [vmem:[#allocation5 + $0xc8] sm:$0xff]  }
 0x2fc   :  { %v2378_v15 = vadd.f32 %v402_v13, %v316_v10  ;;  %v1831_v16 = vpop.f32.mrb[7].mxu0  ;;  %v2056_v10 = vld [vmem:[#allocation5 + $0xc0] sm:$0xff]   ;;  %v2058_v13 = vld [vmem:[#allocation5 + $0xd0] sm:$0xff]  }
 0x2fd   :  { %v2059_v16 = vld [vmem:[#allocation5 + $0xd8] sm:$0xff]  }
 0x2fe   :  { %v438_v17 = vpack.c.bf16 %v2378_v15, %v2376_v14 }
 0x300   :  { %618 = vmatmul.mubr.bf16.vlgmr.msra.gmra.mrb[4].mxu1 %v438_v17  ;;  %1849 = vmatmul.mubr.bf16.vlgmr.msra.gmra.mrb[8].mxu0 %v438_v17  ;;  %v2060_v17 = vld [vmem:[#allocation5 + $0xe0] sm:$0xff]  }
 0x301   :  { %1854 = vmatprep.mubr.msk.bf16.mxu1 %vm2255_vm0, %v2254_v0  ;;  %1900 = vmatprep.mubr.msk.bf16.mxu0 %vm2255_vm0, %v2254_v0 }
 0x3d3   :  { %v619_v26 = vpop.f32.mrb[4].mxu1  ;;  %v662_v27 = vpop.f32.mrb[8].mxu0 }
 0x3d4   :  { %v621_v29 = vpop.f32.mrb[5].mxu1  ;;  %v1850_v30 = vpop.f32.mrb[9].mxu0  ;;  %v620_v33 = vadd.f32 %v619_v26, %v445_v24  ;;  %v663_v34 = vadd.f32 %v662_v27, %v453_v25  ;;  %v842_v26 = vld [vmem:[#allocation8 + $0x4] ss:$0 sm:$0xff] }
 0x3d5   :  { %v623_v31 = vpop.f32.mrb[6].mxu1  ;;  %v665_v32 = vpop.f32.mrb[10].mxu0  ;;  %v622_v39 = vadd.f32 %v621_v29, %v449_v28 }
 0x3d6   :  { %v624_v35 = vadd.f32 %v623_v31, %v445_v24  ;;  %v666_v36 = vadd.f32 %v665_v32, %v453_v25  ;;  %v625_v37 = vpop.f32.mrb[7].mxu1  ;;  %v1851_v38 = vpop.f32.mrb[11].mxu0 }
 0x3d7   :  { %v626_v40 = vadd.f32 %v625_v37, %v449_v28 }
 0x3d8   :  { %v669_v41 = vpack.c.bf16 %v624_v35, %v620_v33  ;;  %v779_v42 = vpack.c.bf16 %v666_v36, %v663_v34  ;;  %v2064_v35 = vld [vmem:[#allocation5 + $0x100] sm:$0xff]   ;;  %v2065_v36 = vld [vmem:[#allocation5 + $0x108] sm:$0xff]  }
 0x3d9   :  { %v670_v43 = vpack.c.bf16 %v626_v40, %v622_v39  ;;  %1885 = vmatpush3.bf16.msra.mxu0 %v2064_v35 }
 0x3da   :  { %1886 = vmatprep.subr.bf16.mxu0 %v2254_v0 }
 0x3db   :  { %1853 = vmatpush3.bf16.xpose.msra.mxu1 %v670_v43 }
 0x3dc   :  { %1858 = vmatprep.subr.bf16.mxu1 %v2254_v0 }
 0x3dd   :  { %1887 = vmatpush3.bf16.msra.mxu0 %v2065_v36 }
 0x3de   :  { %1888 = vmatprep.subr.bf16.mxu0 %v2254_v0 }
 0x3e1   :  { %1889 = vmatpush3.bf16.msra.mxu0 %v2066_v46 }
 0x3e2   :  { %1855 = vmatmul.mubr.bf16.vlgmr.msra.gmra.mrb[8].mxu1 %v669_v41  ;;  %1890 = vmatprep.subr.bf16.mxu0 %v2254_v0 }
 0x3e3   :  { %1859 = vmatpush3.bf16.msra.mxu1 %v779_v42  ;;  %1860 = vmatprep.mubr.msk.bf16.mxu1 %vm2255_vm0, %v2254_v0 }
 0x3e4   :  { %1864 = vmatprep.subr.bf16.mxu1 %v2254_v0 }
 0x3e5   :  { %1891 = vmatpush3.bf16.msra.mxu0 %v2067_v47 }
 0x3e6   :  { %1892 = vmatprep.subr.bf16.mxu0 %v2254_v0 }
 0x3e9   :  { %1893 = vmatpush3.bf16.msra.mxu0 %v2068_v48 }
 0x3ea   :  { %1894 = vmatprep.subr.bf16.mxu0 %v2254_v0 }
 0x4b5   :  { %v705_v49 = vpop.f32.mrb[8].mxu1 }
 0x4b6   :  { %v753_v50 = vsel %vm751_vm1, %v705_v49, -1e+30  ;;  %v1856_v51 = vpop.f32.mrb[9].mxu1  ;;  %v2069_v49 = vld [vmem:[#allocation5 + $0x128] sm:$0xff]  }
 0x4b7   :  { %v708_v52 = vpop.f32.mrb[10].mxu1  ;;  %v756_v53 = vsel %vm755_vm2, %v753_v50, -inf  ;;  %1895 = vmatpush3.bf16.msra.mxu0 %v2069_v49  ;;  %v2071_v51 = vld [vmem:[#allocation5 + $0x138] sm:$0xff]  }
 0x4b8   :  { %v754_v54 = vsel %vm752_vm3, %v708_v52, -1e+30  ;;  %757 = vmax.xlane.f32.xlu0 %v756_v53  ;;  %v1857_v55 = vpop.f32.mrb[11].mxu1  ;;  %1896 = vmatprep.subr.bf16.mxu0 %v2254_v0 }
 0x4b9   :  { %v759_v56 = vsel %vm755_vm2, %v754_v54, -inf }
 0x4bc   :  { %760 = vmax.xlane.f32.xlu0 %v759_v56 }
 0x545   :  { %v758_v57 = vpop.xlane.xlu0 %757 }
 0x546   :  { %v762_v58 = vsub.f32 %v753_v50, %v758_v57  ;;  %v2070_v50 = vld [vmem:[#allocation5 + $0x130] sm:$0xff]  }
 0x547   :  { %1897 = vmatpush3.bf16.msra.mxu0 %v2070_v50  ;;  %v2080_v50 = vld [vmem:[#allocation5 + $0x180] sm:$0xff]  }
 0x548   :  { %v764_v59 = vmul.f32 1.442695, %v762_v58  ;;  %1898 = vmatprep.subr.bf16.mxu0 %v2254_v0 }
 0x549   :  { %v761_v60 = vpop.xlane.xlu0 %760 }
 0x54a   :  { %2104 = vpow2.f32 %v764_v59  ;;  %v763_v61 = vsub.f32 %v754_v54, %v761_v60  ;;  %v960_v59 = vld [vmem:[#allocation8 + $0x5] ss:$0 sm:$0xff] }
 0x54b   :  { %1899 = vmatpush3.bf16.msra.mxu0 %v2071_v51  ;;  %v2081_v51 = vld [vmem:[#allocation5 + $0x188] sm:$0xff]  }
 0x54c   :  { %v766_v62 = vmul.f32 1.442695, %v763_v61  ;;  %1924 = vmatprep.subr.bf16.mxu0 %v2254_v0 }
 0x54e   :  { %2106 = vpow2.f32 %v766_v62 }
 0x554   :  { %v2105_v63 = vpop.eup %2104 }
 0x555   :  { %v768_v1 = vsel %vm755_vm2, %v2105_v63, 0.0 }
 0x556   :  { %769 = vadd.xlane.f32.xlu1 %v768_v1  ;;  %v963_v1 = vld [vmem:[#allocation8 + $0x6] ss:$0 sm:$0xff] }
 0x558   :  { %v2107_v2 = vpop.eup %2106 }
 0x559   :  { %v771_v3 = vsel %vm755_vm2, %v2107_v2, 0.0 }
 0x55a   :  { %772 = vadd.xlane.f32.xlu1 %v771_v3 }
 0x5e3   :  { %v770_v4 = vpop.xlane.xlu1 %769 }
 0x5e4   :  { %2108 = vrcp.f32 %v770_v4 }
 0x5e7   :  { %v773_v5 = vpop.xlane.xlu1 %772 }
 0x5e8   :  { %2110 = vrcp.f32 %v773_v5 }
 0x5ee   :  { %v2109_v6 = vpop.eup %2108 }
 0x5ef   :  { %v776_v8 = vmul.f32 %v2109_v6, %v2105_v63  ;;  %v2072_v6 = vld [vmem:[#allocation5 + $0x140] sm:$0xff]  }
 0x5f2   :  { %v2111_v7 = vpop.eup %2110 }
 0x5f3   :  { %v777_v9 = vmul.f32 %v2111_v7, %v2107_v2  ;;  %v2073_v7 = vld [vmem:[#allocation5 + $0x148] sm:$0xff]  }
 0x5f5   :  { %v778_v11 = vpack.c.bf16 %v777_v9, %v776_v8  ;;  %v2074_v8 = vld [vmem:[#allocation5 + $0x150] sm:$0xff]   ;;  %v2075_v9 = vld [vmem:[#allocation5 + $0x158] sm:$0xff]  }
 0x5f7   :  { %1861 = vmatmul.mubr.msk.bf16.vlgmr.msra.gmra.mrb[12].mxu1 %vm755_vm2, %v778_v11  ;;  %v2077_v11 = vld [vmem:[#allocation5 + $0x168] sm:$0xff]  }
 0x5f8   :  { %1865 = vmatpush3.bf16.msra.mxu1 %v2056_v10  ;;  %1880 = vmatprep.mubr.msk.bf16.mxu1 %vm2255_vm0, %v2254_v0  ;;  %v2076_v10 = vld [vmem:[#allocation5 + $0x160] sm:$0xff]  }
 0x5f9   :  { %1866 = vmatprep.subr.bf16.mxu1 %v2254_v0 }
 0x5fc   :  { %1867 = vmatpush3.bf16.msra.mxu1 %v2057_v12  ;;  %v2078_v12 = vld [vmem:[#allocation5 + $0x170] sm:$0xff]  }
 0x5fd   :  { %1868 = vmatprep.subr.bf16.mxu1 %v2254_v0 }
 0x600   :  { %1869 = vmatpush3.bf16.msra.mxu1 %v2058_v13  ;;  %v2079_v13 = vld [vmem:[#allocation5 + $0x178] sm:$0xff]  }
 0x601   :  { %1870 = vmatprep.subr.bf16.mxu1 %v2254_v0 }
 0x604   :  { %1871 = vmatpush3.bf16.msra.mxu1 %v2059_v16  ;;  %v984_v16 = vld [vmem:[#allocation8 + $0x7] ss:$0 sm:$0xff] }
 0x605   :  { %1872 = vmatprep.subr.bf16.mxu1 %v2254_v0 }
 0x608   :  { %1873 = vmatpush3.bf16.msra.mxu1 %v2060_v17 }
 0x609   :  { %1874 = vmatprep.subr.bf16.mxu1 %v2254_v0 }
 0x60c   :  { %1875 = vmatpush3.bf16.msra.mxu1 %v2061_v18 }
 0x60d   :  { %1876 = vmatprep.subr.bf16.mxu1 %v2254_v0 }
 0x610   :  { %1877 = vmatpush3.bf16.msra.mxu1 %v2062_v19 }
 0x611   :  { %1878 = vmatprep.subr.bf16.mxu1 %v2254_v0 }
 0x614   :  { %1879 = vmatpush3.bf16.msra.mxu1 %v2063_v20 }
 0x615   :  { %1904 = vmatprep.subr.bf16.mxu1 %v2254_v0 }
 0x6ca   :  { %v817_v21 = vpop.f32.mrb[12].mxu1 }
 0x6cb   :  { %v1862_v22 = vpop.f32.mrb[13].mxu1 }
 0x6cc   :  { %v820_v23 = vpop.f32.mrb[14].mxu1 }
 0x6cd   :  { %v841_v24 = vpack.c.bf16 %v820_v23, %v817_v21  ;;  %v1863_v25 = vpop.f32.mrb[15].mxu1 }
 0x6cf   :  { %1881 = vmatmul.mubr.bf16.vlgmr.msra.gmra.mrb[16].mxu1 %v841_v24 }
 0x6d0   :  { %1920 = vmatprep.mubr.msk.bf16.mxu1 %vm2255_vm0, %v2254_v0  ;;  %1905 = vmatpush3.bf16.msra.mxu1 %v2072_v6  ;;  %v2090_v6 = vld [vmem:[#allocation5 + $0x1d0] sm:$0xff]  }
 0x6d1   :  { %1906 = vmatprep.subr.bf16.mxu1 %v2254_v0 }
 0x6d4   :  { %1907 = vmatpush3.bf16.msra.mxu1 %v2073_v7  ;;  %v2091_v7 = vld [vmem:[#allocation5 + $0x1d8] sm:$0xff]  }
 0x6d5   :  { %1908 = vmatprep.subr.bf16.mxu1 %v2254_v0 }
 0x6d8   :  { %1909 = vmatpush3.bf16.msra.mxu1 %v2074_v8  ;;  %v2092_v8 = vld [vmem:[#allocation5 + $0x1e0] sm:$0xff]  }
 0x6d9   :  { %1910 = vmatprep.subr.bf16.mxu1 %v2254_v0 }
 0x6dc   :  { %1911 = vmatpush3.bf16.msra.mxu1 %v2075_v9  ;;  %v2093_v9 = vld [vmem:[#allocation5 + $0x1e8] sm:$0xff]  }
 0x6dd   :  { %1912 = vmatprep.subr.bf16.mxu1 %v2254_v0 }
 0x6e0   :  { %1913 = vmatpush3.bf16.msra.mxu1 %v2076_v10 }
 0x6e1   :  { %1914 = vmatprep.subr.bf16.mxu1 %v2254_v0 }
 0x6e4   :  { %1915 = vmatpush3.bf16.msra.mxu1 %v2077_v11 }
 0x6e5   :  { %1916 = vmatprep.subr.bf16.mxu1 %v2254_v0 }
 0x6e8   :  { %1917 = vmatpush3.bf16.msra.mxu1 %v2078_v12 }
 0x6e9   :  { %1918 = vmatprep.subr.bf16.mxu1 %v2254_v0 }
 0x6ec   :  { %1919 = vmatpush3.bf16.msra.mxu1 %v2079_v13 }
 0x6ed   :  { %1944 = vmatprep.subr.bf16.mxu1 %v2254_v0 }
 0x7a2   :  { %v925_v27 = vpop.f32.mrb[16].mxu1 }
 0x7a3   :  { %v926_v28 = vadd.f32 %v925_v27, %v842_v26  ;;  %v1882_v29 = vpop.f32.mrb[17].mxu1 }
 0x7a4   :  { %v928_v30 = vpop.f32.mrb[18].mxu1 }
 0x7a5   :  { %v929_v31 = vadd.f32 %v928_v30, %v842_v26  ;;  %v1883_v32 = vpop.f32.mrb[19].mxu1  ;;  %v932_v33 = vadd.f32 %v926_v28, %v2376_v14 }
 0x7a7   :  { %934 = vadd.xlane.f32.xlu0 %v932_v33  ;;  %v933_v34 = vadd.f32 %v929_v31, %v2378_v15 }
 0x7a9   :  { %936 = vadd.xlane.f32.xlu1 %v933_v34 }
 0x834   :  { %v935_v37 = vpop.xlane.xlu0 %934 }
 0x835   :  { %v938_v38 = vmul.f32 0.11111111, %v935_v37 }
 0x836   :  { %v937_v39 = vpop.xlane.xlu1 %936 }
 0x837   :  { %v940_v40 = vsub.f32 %v932_v33, %v938_v38  ;;  %v939_v41 = vmul.f32 0.11111111, %v937_v39 }
 0x839   :  { %v941_v14 = vsub.f32 %v933_v34, %v939_v41  ;;  %v944_v15 = vsel %vm76_vm4, %v940_v40, 0.0 }
 0x83a   :  { %v946_v42 = vmul.f32 %v944_v15, %v944_v15 }
 0x83b   :  { %v945_v43 = vsel %vm76_vm4, %v941_v14, 0.0  ;;  %v1110_v14 = vld [vmem:[#allocation8 + $0x18] ss:$0 sm:$0xff] }
 0x83c   :  { %948 = vadd.xlane.f32.xlu0 %v946_v42  ;;  %v947_v45 = vmul.f32 %v945_v43, %v945_v43 }
 0x83e   :  { %950 = vadd.xlane.f32.xlu1 %v947_v45 }
 0x8c9   :  { %v949_v52 = vpop.xlane.xlu0 %948 }
 0x8ca   :  { %v952_v53 = vmul.f32 0.11111111, %v949_v52 }
 0x8cb   :  { %v951_v54 = vpop.xlane.xlu1 %950 }
 0x8cc   :  { %v954_v55 = vadd.f32 1e-05, %v952_v53  ;;  %v953_v56 = vmul.f32 0.11111111, %v951_v54 }
 0x8ce   :  { %2112 = vrsqrt.f32 %v954_v55  ;;  %v955_v57 = vadd.f32 1e-05, %v953_v56 }
 0x8d0   :  { %2114 = vrsqrt.f32 %v955_v57 }
 0x8d8   :  { %v2113_v58 = vpop.eup %2112 }
 0x8d9   :  { %v958_v60 = vmul.f32 %v2113_v58, %v944_v15 }
 0x8da   :  { %v2115_v61 = vpop.eup %2114 }
 0x8db   :  { %v959_v62 = vmul.f32 %v2115_v61, %v945_v43  ;;  %v961_v63 = vmul.f32 %v960_v59, %v958_v60 }
 0x8dd   :  { %v962_v2 = vmul.f32 %v960_v59, %v959_v62  ;;  %v2425_v3 = vadd.f32 %v963_v1, %v961_v63  ;;  %v2082_v62 = vld [vmem:[#allocation5 + $0x190] sm:$0xff]   ;;  %v2083_v63 = vld [vmem:[#allocation5 + $0x198] sm:$0xff]  }
 0x8df   :  { %v2427_v4 = vadd.f32 %v963_v1, %v962_v2  ;;  %v2084_v1 = vld [vmem:[#allocation5 + $0x1a0] sm:$0xff]   ;;  %v2085_v2 = vld [vmem:[#allocation5 + $0x1a8] sm:$0xff]  }
 0x8e1   :  { %v983_v5 = vpack.c.bf16 %v2427_v4, %v2425_v3 }
 0x8e3   :  { %1901 = vmatmul.mubr.bf16.vlgmr.msra.gmra.mrb[12].mxu0 %v983_v5  ;;  %v2089_v5 = vld [vmem:[#allocation5 + $0x1c8] sm:$0xff]  }
 0x8e4   :  { %1940 = vmatprep.mubr.msk.bf16.mxu0 %vm2255_vm0, %v2254_v0  ;;  %1925 = vmatpush3.bf16.msra.mxu0 %v2080_v50 }
 0x8e5   :  { %1926 = vmatprep.subr.bf16.mxu0 %v2254_v0 }
 0x8e8   :  { %1927 = vmatpush3.bf16.msra.mxu0 %v2081_v51 }
 0x8e9   :  { %1928 = vmatprep.subr.bf16.mxu0 %v2254_v0 }
 0x8ec   :  { %1929 = vmatpush3.bf16.msra.mxu0 %v2082_v62 }
 0x8ed   :  { %1930 = vmatprep.subr.bf16.mxu0 %v2254_v0 }
 0x8f0   :  { %1931 = vmatpush3.bf16.msra.mxu0 %v2083_v63 }
 0x8f1   :  { %1932 = vmatprep.subr.bf16.mxu0 %v2254_v0 }
 0x8f4   :  { %1933 = vmatpush3.bf16.msra.mxu0 %v2084_v1 }
 0x8f5   :  { %1934 = vmatprep.subr.bf16.mxu0 %v2254_v0 }
 0x8f8   :  { %1935 = vmatpush3.bf16.msra.mxu0 %v2085_v2 }
 0x8f9   :  { %1936 = vmatprep.subr.bf16.mxu0 %v2254_v0 }
 0x8fc   :  { %1937 = vmatpush3.bf16.msra.mxu0 %v2086_v44 }
 0x8fd   :  { %1938 = vmatprep.subr.bf16.mxu0 %v2254_v0 }
 0x9b6   :  { %v1067_v17 = vpop.f32.mrb[12].mxu0 }
 0x9b7   :  { %v1068_v18 = vadd.f32 %v1067_v17, %v984_v16  ;;  %v1902_v19 = vpop.f32.mrb[13].mxu0 }
 0x9b8   :  { %v1070_v20 = vpop.f32.mrb[14].mxu0  ;;  %v1226_v19 = vld [vmem:[#allocation8 + $0x19] ss:$0 sm:$0xff] }
 0x9b9   :  { %v1076_v21 = vmul.f32 0.044715, %v1068_v18  ;;  %v1071_v22 = vadd.f32 %v1070_v20, %v984_v16  ;;  %v1903_v23 = vpop.f32.mrb[15].mxu0  ;;  %v1074_v36 = vmul.f32 0.5, %v1068_v18 }
 0x9bb   :  { %v1078_v24 = vmul.f32 %v1076_v21, %v1068_v18  ;;  %v1077_v25 = vmul.f32 0.044715, %v1071_v22  ;;  %v1075_v37 = vmul.f32 0.5, %v1071_v22 }
 0x9bd   :  { %v1080_v26 = vmul.f32 %v1078_v24, %v1068_v18  ;;  %v1079_v27 = vmul.f32 %v1077_v25, %v1071_v22  ;;  %v1229_v24 = vld [vmem:[#allocation8 + $0x1a] ss:$0 sm:$0xff] }
 0x9bf   :  { %v1082_v28 = vadd.f32 %v1080_v26, %v1068_v18  ;;  %v1081_v29 = vmul.f32 %v1079_v27, %v1071_v22 }
 0x9c1   :  { %v1084_v30 = vmul.f32 0.7978846, %v1082_v28  ;;  %v1083_v31 = vadd.f32 %v1081_v29, %v1071_v22  ;;  %v2094_v29 = vld [vmem:[#allocation5 + $0x1f0] sm:$0xff]  }
 0x9c3   :  { %2116 = vtanh.f32 %v1084_v30  ;;  %v1085_v32 = vmul.f32 0.7978846, %v1083_v31  ;;  %v2095_v30 = vld [vmem:[#allocation5 + $0x1f8] sm:$0xff]   ;;  %v2096_v31 = vld [vmem:[#allocation5 + $0x200] sm:$0xff]  }
 0x9c5   :  { %2118 = vtanh.f32 %v1085_v32  ;;  %v2097_v32 = vld [vmem:[#allocation5 + $0x208] sm:$0xff]  }
 0x9cd   :  { %v2117_v33 = vpop.eup %2116 }
 0x9ce   :  { %v1088_v34 = vadd.f32 1.0, %v2117_v33  ;;  %v2098_v33 = vld [vmem:[#allocation5 + $0x210] sm:$0xff]  }
 0x9cf   :  { %v2119_v35 = vpop.eup %2118 }
 0x9d0   :  { %v1089_v38 = vadd.f32 1.0, %v2119_v35  ;;  %v1090_v39 = vmul.f32 %v1088_v34, %v1074_v36  ;;  %v2099_v34 = vld [vmem:[#allocation5 + $0x218] sm:$0xff]   ;;  %v2100_v35 = vld [vmem:[#allocation5 + $0x220] sm:$0xff]   ;;  %v2101_v36 = vld [vmem:[#allocation5 + $0x228] sm:$0xff]  }
 0x9d2   :  { %v1091_v40 = vmul.f32 %v1089_v38, %v1075_v37  ;;  %v1250_v37 = vld [vmem:[#allocation8 + $0x1b] ss:$0 sm:$0xff] }
 0x9d4   :  { %v1109_v41 = vpack.c.bf16 %v1091_v40, %v1090_v39 }
 0x9d6   :  { %1921 = vmatmul.mubr.bf16.vlgmr.msra.gmra.mrb[20].mxu1 %v1109_v41 }
 0x9d7   :  { %1960 = vmatprep.mubr.msk.bf16.mxu1 %vm2255_vm0, %v2254_v0 }
 0xaa9   :  { %v1193_v15 = vpop.f32.mrb[20].mxu1 }
 0xaaa   :  { %v1194_v42 = vadd.f32 %v1193_v15, %v1110_v14  ;;  %v1922_v43 = vpop.f32.mrb[21].mxu1 }
 0xaab   :  { %v1196_v45 = vpop.f32.mrb[22].mxu1 }
 0xaac   :  { %v1197_v46 = vadd.f32 %v1196_v45, %v1110_v14  ;;  %v1923_v47 = vpop.f32.mrb[23].mxu1  ;;  %v1200_v48 = vadd.f32 %v1194_v42, %v2425_v3  ;;  %v2087_v3 = vld [vmem:[#allocation5 + $0x1b8] sm:$0xff]  }
 0xaad   :  { %1939 = vmatpush3.bf16.msra.mxu0 %v2087_v3  ;;  %v2103_v47 = vld [vmem:[#allocation5 + $0x238] sm:$0xff]  }
 0xaae   :  { %1202 = vadd.xlane.f32.xlu0 %v1200_v48  ;;  %v1201_v49 = vadd.f32 %v1197_v46, %v2427_v4  ;;  %1964 = vmatprep.subr.bf16.mxu0 %v2254_v0  ;;  %v2088_v4 = vld [vmem:[#allocation5 + $0x1c0] sm:$0xff]   ;;  %v2102_v46 = vld [vmem:[#allocation5 + $0x230] sm:$0xff]  }
 0xaaf   :  { %1945 = vmatpush3.bf16.msra.mxu1 %v2088_v4 }
 0xab0   :  { %1204 = vadd.xlane.f32.xlu1 %v1201_v49  ;;  %1946 = vmatprep.subr.bf16.mxu1 %v2254_v0 }
 0xab3   :  { %1947 = vmatpush3.bf16.msra.mxu1 %v2089_v5 }
 0xab4   :  { %1948 = vmatprep.subr.bf16.mxu1 %v2254_v0 }
 0xab7   :  { %1949 = vmatpush3.bf16.msra.mxu1 %v2090_v6 }
 0xab8   :  { %1950 = vmatprep.subr.bf16.mxu1 %v2254_v0 }
 0xabb   :  { %1951 = vmatpush3.bf16.msra.mxu1 %v2091_v7 }
 0xabc   :  { %1952 = vmatprep.subr.bf16.mxu1 %v2254_v0 }
 0xabf   :  { %1953 = vmatpush3.bf16.msra.mxu1 %v2092_v8 }
 0xac0   :  { %1954 = vmatprep.subr.bf16.mxu1 %v2254_v0 }
 0xac3   :  { %1955 = vmatpush3.bf16.msra.mxu1 %v2093_v9 }
 0xac4   :  { %1956 = vmatprep.subr.bf16.mxu1 %v2254_v0 }
 0xac7   :  { %1957 = vmatpush3.bf16.msra.mxu1 %v2094_v29 }
 0xac8   :  { %1958 = vmatprep.subr.bf16.mxu1 %v2254_v0 }
 0xacb   :  { %1959 = vmatpush3.bf16.msra.mxu1 %v2095_v30 }
 0xb3b   :  { %v1203_v52 = vpop.xlane.xlu0 %1202 }
 0xb3c   :  { %v1206_v53 = vmul.f32 0.11111111, %v1203_v52 }
 0xb3d   :  { %v1205_v54 = vpop.xlane.xlu1 %1204 }
 0xb3e   :  { %v1208_v55 = vsub.f32 %v1200_v48, %v1206_v53  ;;  %v1207_v56 = vmul.f32 0.11111111, %v1205_v54  ;;  %v1360_v48 = vld [vmem:[#allocation8 + $0x1c] ss:$0 sm:$0xff] }
 0xb40   :  { %v1209_v57 = vsub.f32 %v1201_v49, %v1207_v56  ;;  %v1210_v58 = vsel %vm76_vm4, %v1208_v55, 0.0 }
 0xb41   :  { %v1212_v59 = vmul.f32 %v1210_v58, %v1210_v58 }
 0xb42   :  { %v1211_v60 = vsel %vm76_vm4, %v1209_v57, 0.0 }
 0xb43   :  { %1214 = vadd.xlane.f32.xlu0 %v1212_v59  ;;  %v1213_v61 = vmul.f32 %v1211_v60, %v1211_v60 }
 0xb45   :  { %1216 = vadd.xlane.f32.xlu1 %v1213_v61 }
 0xbd0   :  { %v1215_v10 = vpop.xlane.xlu0 %1214 }
 0xbd1   :  { %v1218_v11 = vmul.f32 0.11111111, %v1215_v10 }
 0xbd2   :  { %v1217_v12 = vpop.xlane.xlu1 %1216 }
 0xbd3   :  { %v1220_v13 = vadd.f32 1e-05, %v1218_v11  ;;  %v1219_v16 = vmul.f32 0.11111111, %v1217_v12 }
 0xbd5   :  { %2120 = vrsqrt.f32 %v1220_v13  ;;  %v1221_v17 = vadd.f32 1e-05, %v1219_v16 }
 0xbd7   :  { %2122 = vrsqrt.f32 %v1221_v17 }
 0xbdf   :  { %v2121_v18 = vpop.eup %2120 }
 0xbe0   :  { %v1224_v20 = vmul.f32 %v2121_v18, %v1210_v58  ;;  %v1470_v58 = vld [vmem:[#allocation8 + $0x1d] ss:$0 sm:$0xff] }
 0xbe1   :  { %v2123_v21 = vpop.eup %2122 }
 0xbe2   :  { %v1225_v22 = vmul.f32 %v2123_v21, %v1211_v60  ;;  %v1227_v23 = vmul.f32 %v1226_v19, %v1224_v20 }
 0xbe4   :  { %v1228_v25 = vmul.f32 %v1226_v19, %v1225_v22  ;;  %v1230_v26 = vadd.f32 %v1229_v24, %v1227_v23 }
 0xbe6   :  { %v1231_v27 = vadd.f32 %v1229_v24, %v1228_v25 }
 0xbe8   :  { %v1249_v28 = vpack.c.bf16 %v1231_v27, %v1230_v26 }
 0xbea   :  { %1941 = vmatmul.mubr.bf16.vlgmr.msra.gmra.mrb[16].mxu0 %v1249_v28 }
 0xbeb   :  { %1980 = vmatprep.mubr.msk.bf16.mxu0 %vm2255_vm0, %v2254_v0  ;;  %1965 = vmatpush3.bf16.msra.mxu0 %v2096_v31 }
 0xbec   :  { %1966 = vmatprep.subr.bf16.mxu0 %v2254_v0 }
 0xbef   :  { %1967 = vmatpush3.bf16.msra.mxu0 %v2097_v32 }
 0xbf0   :  { %1968 = vmatprep.subr.bf16.mxu0 %v2254_v0 }
 0xbf3   :  { %1969 = vmatpush3.bf16.msra.mxu0 %v2098_v33 }
 0xbf4   :  { %1970 = vmatprep.subr.bf16.mxu0 %v2254_v0 }
 0xbf7   :  { %1971 = vmatpush3.bf16.msra.mxu0 %v2099_v34 }
 0xbf8   :  { %1972 = vmatprep.subr.bf16.mxu0 %v2254_v0 }
 0xbfb   :  { %1973 = vmatpush3.bf16.msra.mxu0 %v2100_v35 }
 0xbfc   :  { %1974 = vmatprep.subr.bf16.mxu0 %v2254_v0 }
 0xbff   :  { %1975 = vmatpush3.bf16.msra.mxu0 %v2101_v36 }
 0xc00   :  { %1976 = vmatprep.subr.bf16.mxu0 %v2254_v0 }
 0xc03   :  { %1977 = vmatpush3.bf16.msra.mxu0 %v2102_v46 }
 0xc04   :  { %1978 = vmatprep.subr.bf16.mxu0 %v2254_v0 }
 0xc07   :  { %1979 = vmatpush3.bf16.msra.mxu0 %v2103_v47 }
 0xcbd   :  { %v1333_v38 = vpop.f32.mrb[16].mxu0 }
 0xcbe   :  { %v1334_v39 = vadd.f32 %v1333_v38, %v1250_v37  ;;  %v1942_v40 = vpop.f32.mrb[17].mxu0 }
 0xcbf   :  { %v1336_v41 = vpop.f32.mrb[18].mxu0 }
 0xcc0   :  { %v1337_v14 = vadd.f32 %v1336_v41, %v1250_v37  ;;  %v1943_v15 = vpop.f32.mrb[19].mxu0  ;;  %v1340_v42 = vmax.f32 %v1334_v39, 0.0 }
 0xcc2   :  { %v1341_v43 = vmax.f32 %v1337_v14, 0.0 }
 0xcc4   :  { %v1359_v45 = vpack.c.bf16 %v1341_v43, %v1340_v42 }
 0xcc6   :  { %1961 = vmatmul.mubr.bf16.vlgmr.msra.gmra.mrb[24].mxu1 %v1359_v45 }
 0xd99   :  { %v1443_v49 = vpop.f32.mrb[24].mxu1 }
 0xd9a   :  { %v1444_v50 = vadd.f32 %v1443_v49, %v1360_v48  ;;  %v1962_v51 = vpop.f32.mrb[25].mxu1 }
 0xd9b   :  { %v1446_v52 = vpop.f32.mrb[26].mxu1 }
 0xd9c   :  { %v1447_v53 = vadd.f32 %v1446_v52, %v1360_v48  ;;  %v1963_v54 = vpop.f32.mrb[27].mxu1  ;;  %v1450_v55 = vmax.f32 %v1444_v50, 0.0 }
 0xd9e   :  { %v1451_v56 = vmax.f32 %v1447_v53, 0.0 }
 0xda0   :  { %v1469_v57 = vpack.c.bf16 %v1451_v56, %v1450_v55 }
 0xda2   :  { %1981 = vmatmul.mubr.bf16.vlgmr.msra.gmra.mrb[20].mxu0 %v1469_v57 }
 0xe75   :  { %v1553_v59 = vpop.f32.mrb[20].mxu0 }
 0xe76   :  { %v1554_v60 = vadd.f32 %v1553_v59, %v1470_v58  ;;  %v1982_v61 = vpop.f32.mrb[21].mxu0 }
 0xe77   :  { %v1556_v0 = vpop.f32.mrb[22].mxu0 }
 0xe78   :  { %1560 = vst [vmem:[#allocation10] sm:$0xff] %v1554_v60  ;;  %v1557_v62 = vadd.f32 %v1556_v0, %v1470_v58  ;;  %v1983_v63 = vpop.f32.mrb[23].mxu0 }
 0xe7a   :  { %1561 = vst [vmem:[#allocation10 + $0x8] sm:$0xff] %v1557_v62 }
 0xe7b   :  { %2223 = shalt.err (!%p2220_p8)
}
 0xe7c   :  { %s2224_s21 = scalar_lea.hbm %s2492_s4, 256 }
 0xe7d   :  { %p2225_p9 = scmp.ne.s32.totalorder %s2492_s4, %s2224_s21  ;;  %p2228_p10 = scmp.lt.u32.totalorder %s2224_s21, %s2492_s4 }
 0xe7f   :  { %p2230_p11 = pnand %p2228_p10, %p2225_p9 }
 0xe81   :  { %2233 = shalt.err (!%p2230_p11)
}
 0xe82   :  { %1573 = dma.vmem_to_hbm [thread:$0]  %s1568_s17, 256, %s2492_s4, [#allocation4], %s2246_s1, %s2246_s1, %s2247_s13  }
 0xe83   :  { %2240 = dma.done.wait [#allocation4], 256  }
 0xe84   :  { %2241 = vsyncadd [#allocation4], 4294967040 }
 0xe85   :  { %1577 = vsyncpa [#allocation3], 1 }
 0xe86   :  { %1578 = vsyncpa [#allocation6], 1 }
 0xe87   :  { %1579 = vsyncpa [#allocation9], 1 }
 0xe88   :  { %1580 = vsyncpa [#allocation4], 1 }

</bundles_post_ra>
